<compile_context>
chip_gen: v7x
topology: tpu7x:2x2x1
jax: 0.10.0
libtpu: 0.0.40
codegen_flags: <defaults>
</compile_context>

<pallas_src>
import functools

import jax
import jax.numpy as jnp
from jax import lax
from jax.experimental import pallas as pl
from jax.experimental.pallas import tpu as pltpu


# ----------------------------- Pallas kernel --------------------------------
def _bigru_kernel(x_ref,        # (T*Bp, E)  time-major, batch-padded, flattened
                  wih_ref,      # (E, 6H)    [fwd r,z,n | bwd r,z,n] (transposed)
                  b_gi_ref,     # (1, 6H)    b_ih (+ b_hh for r,z gates) folded
                  whh_f_ref,    # (H, 3H)
                  whh_b_ref,    # (H, 3H)
                  bhh_n_ref,    # (1, 2H)    [b_hh_n fwd | b_hh_n bwd]
                  out_ref,      # (T, Bp, 2H)  [..., :H]=fwd, [..., H:]=bwd
                  gi_scr):      # scratch VMEM (T*Bp, 6H)
    T, Bp, H2 = out_ref.shape
    H = H2 // 2

    # --- hoisted input projection: one big MXU GEMM for every timestep and
    #     both directions, with b_ih (and b_hh for r/z) pre-folded into it. ---
    gi_scr[...] = (
        jnp.dot(x_ref[...], wih_ref[...], preferred_element_type=jnp.float32)
        + b_gi_ref[...])

    # Recurrent weights stay resident across all timesteps.
    whh_f = whh_f_ref[...]
    whh_b = whh_b_ref[...]
    bhh_n_f = bhh_n_ref[:, :H]      # (1, H)
    bhh_n_b = bhh_n_ref[:, H:]      # (1, H)

    def gate_step(gi3, gh3, bhn, h):
        # PyTorch gate layout [r, z, n]; b_hh_n must stay inside the r-multiply.
        r = jax.nn.sigmoid(gi3[:, :H] + gh3[:, :H])
        z = jax.nn.sigmoid(gi3[:, H:2 * H] + gh3[:, H:2 * H])
        n = jnp.tanh(gi3[:, 2 * H:] + r * (gh3[:, 2 * H:] + bhn))
        return (1.0 - z) * n + z * h

    h0 = jnp.zeros((Bp, H), jnp.float32)

    # --- fused fwd/bwd recurrence (independent per-iteration work), fully
    #     unrolled for the short fixed T so LLO can overlap the two dots. ---
    def body(i, carry):
        h_f, h_b = carry
        tf = i
        tb = T - 1 - i
        row_f = pl.multiple_of(tf * Bp, 8)
        row_b = pl.multiple_of(tb * Bp, 8)
        gi_f = gi_scr[pl.ds(row_f, Bp), :][:, :3 * H]      # (Bp, 3H)
        gi_b = gi_scr[pl.ds(row_b, Bp), :][:, 3 * H:]      # (Bp, 3H)
        gh_f = jnp.dot(h_f, whh_f, preferred_element_type=jnp.float32)
        gh_b = jnp.dot(h_b, whh_b, preferred_element_type=jnp.float32)
        h_f_new = gate_step(gi_f, gh_f, bhh_n_f, h_f)
        h_b_new = gate_step(gi_b, gh_b, bhh_n_b, h_b)
        out_ref[tf, :, :H] = h_f_new
        out_ref[tb, :, H:] = h_b_new
        return (h_f_new, h_b_new)

    lax.fori_loop(0, T, body, (h0, h0), unroll=True)


# ------------------------------- wrapper -------------------------------------
@functools.partial(jax.jit, static_argnames=("hidden_size",))
def encoder_forward(x_ids, params, *, hidden_size):
    """Returns (hidden_cat (B, 2H), out (B, T, 2H)) — same as the torch module."""
    H = hidden_size
    emb = params["emb"]                                   # (V, E)
    # Embedding lookup kept in plain-JAX glue; the recurrence is the hot path.
    x = jnp.take(emb, x_ids, axis=0).astype(jnp.float32)  # (B, T, E)
    B, T, E = x.shape

    # Batch padded to a sublane multiple (8 for f32); padded rows are sliced off.
    Bp = ((B + 7) // 8) * 8
    x_tbe = jnp.transpose(x, (1, 0, 2))                   # (T, B, E) time-major
    x_tbe = jnp.pad(x_tbe, ((0, 0), (0, Bp - B), (0, 0)))
    x_flat = x_tbe.reshape(T * Bp, E)                     # (T*Bp, E)

    # Concatenated, pre-transposed input-projection weights: (E, 6H).
    wih = jnp.concatenate([params["w_ih_f"].T, params["w_ih_b"].T], axis=1)
    whh_f = params["w_hh_f"].T                            # (H, 3H)
    whh_b = params["w_hh_b"].T                            # (H, 3H)

    def fold_gi_bias(b_ih, b_hh):
        # r,z gates: b_ih + b_hh folded into the precomputed projection;
        # n gate: only b_ih (b_hh_n must stay inside the r-multiplied term).
        return jnp.concatenate([b_ih[:2 * H] + b_hh[:2 * H], b_ih[2 * H:]])

    b_gi = jnp.concatenate(
        [fold_gi_bias(params["b_ih_f"], params["b_hh_f"]),
         fold_gi_bias(params["b_ih_b"], params["b_hh_b"])]).reshape(1, 6 * H)
    bhh_n = jnp.concatenate(
        [params["b_hh_f"][2 * H:], params["b_hh_b"][2 * H:]]).reshape(1, 2 * H)

    vmem = pl.BlockSpec(memory_space=pltpu.MemorySpace.VMEM)
    out_tbh = pl.pallas_call(
        _bigru_kernel,
        out_shape=jax.ShapeDtypeStruct((T, Bp, 2 * H), jnp.float32),
        in_specs=[vmem] * 6,
        out_specs=vmem,
        scratch_shapes=[pltpu.VMEM((T * Bp, 6 * H), jnp.float32)],
    )(x_flat, wih, b_gi, whh_f, whh_b, bhh_n)

    # Final hiddens are just slices of the combined output buffer.
    hidden_cat = jnp.concatenate(
        [out_tbh[T - 1, :B, :H], out_tbh[0, :B, H:]], axis=-1)   # (B, 2H)
    out = jnp.transpose(out_tbh[:, :B, :], (1, 0, 2))            # (B, T, 2H)
    return hidden_cat, out


# ------------------------- pure-JAX reference --------------------------------
def encoder_reference(x_ids, params, hidden_size):
    H = hidden_size
    x = jnp.take(params["emb"], x_ids, axis=0).astype(jnp.float32)  # (B, T, E)
    B, T, _ = x.shape

    def cell(x_t, h, wih, whh, bih, bhh):
        gi = x_t @ wih.T + bih
        gh = h @ whh.T + bhh
        r = jax.nn.sigmoid(gi[:, :H] + gh[:, :H])
        z = jax.nn.sigmoid(gi[:, H:2 * H] + gh[:, H:2 * H])
        n = jnp.tanh(gi[:, 2 * H:] + r * gh[:, 2 * H:])
        return (1.0 - z) * n + z * h

    h = jnp.zeros((B, H), jnp.float32)
    outs_f = []
    for t in range(T):
        h = cell(x[:, t], h, params["w_ih_f"], params["w_hh_f"],
                 params["b_ih_f"], params["b_hh_f"])
        outs_f.append(h)
    h_f = h

    h = jnp.zeros((B, H), jnp.float32)
    outs_b = [None] * T
    for t in reversed(range(T)):
        h = cell(x[:, t], h, params["w_ih_b"], params["w_hh_b"],
                 params["b_ih_b"], params["b_hh_b"])
        outs_b[t] = h
    h_b = h

    out = jnp.concatenate(
        [jnp.stack(outs_f, axis=1), jnp.stack(outs_b, axis=1)], axis=-1)
    return jnp.concatenate([h_f, h_b], axis=-1), out


# --------------------------------- main ---------------------------------------
def init_params(key, vocab, emb_size, hidden_size):
    H, E = hidden_size, emb_size
    ks = jax.random.split(key, 9)
    bound = 1.0 / jnp.sqrt(H)
    u = lambda k, shape: jax.random.uniform(k, shape, jnp.float32, -bound, bound)
    return {
        "emb":    jax.random.normal(ks[0], (vocab, E), jnp.float32),
        "w_ih_f": u(ks[1], (3 * H, E)),
        "w_hh_f": u(ks[2], (3 * H, H)),
        "b_ih_f": u(ks[3], (3 * H,)),
        "b_hh_f": u(ks[4], (3 * H,)),
        "w_ih_b": u(ks[5], (3 * H, E)),
        "w_hh_b": u(ks[6], (3 * H, H)),
        "b_ih_b": u(ks[7], (3 * H,)),
        "b_hh_b": u(ks[8], (3 * H,)),
    }


if __name__ == "__main__":
    INPUT_DIM = 20     # vocab size
    EMB_SIZE = 16
    HIDDEN = 32
    B, T = 2, 8

    key = jax.random.PRNGKey(0)
    k_par, k_x = jax.random.split(key)
    params = init_params(k_par, INPUT_DIM, EMB_SIZE, HIDDEN)
    x_ids = jax.random.randint(k_x, (B, T), 0, INPUT_DIM, dtype=jnp.int32)

    hidden_cat, out = encoder_forward(x_ids, params, hidden_size=HIDDEN)
    jax.block_until_ready((hidden_cat, out))

    # correctness check against a plain-JAX reference of the same math
    ref_hidden, ref_out = encoder_reference(x_ids, params, HIDDEN)
    assert hidden_cat.shape == (B, 2 * HIDDEN)
    assert out.shape == (B, T, 2 * HIDDEN)
    assert jnp.allclose(hidden_cat, ref_hidden, atol=2e-3, rtol=2e-3)
    assert jnp.allclose(out, ref_out, atol=2e-3, rtol=2e-3)

    print("KERNEL_OK")
</pallas_src>

<mosaic_0001>
module attributes {stable_mosaic.version = 11 : i64} {
  func.func @_bigru_kernel(%arg0: memref<64x16xf32, #tpu.memory_space<vmem>>, %arg1: memref<16x192xf32, #tpu.memory_space<vmem>>, %arg2: memref<1x192xf32, #tpu.memory_space<vmem>>, %arg3: memref<32x96xf32, #tpu.memory_space<vmem>>, %arg4: memref<32x96xf32, #tpu.memory_space<vmem>>, %arg5: memref<1x64xf32, #tpu.memory_space<vmem>>, %arg6: memref<8x8x64xf32, #tpu.memory_space<vmem>>, %arg7: memref<64x192xf32, #tpu.memory_space<vmem>>) attributes {dimension_semantics = [], scalar_prefetch = 0 : i64, scratch_operands = 1 : i64, tpu.core_type = #tpu.core_type<tc>} {
    %c0 = arith.constant 0 : index
    %c0_0 = arith.constant 0 : index
    %0 = vector.load %arg0[%c0, %c0_0] : memref<64x16xf32, #tpu.memory_space<vmem>>, vector<64x16xf32>
    %c0_1 = arith.constant 0 : index
    %c0_2 = arith.constant 0 : index
    %1 = vector.load %arg1[%c0_1, %c0_2] : memref<16x192xf32, #tpu.memory_space<vmem>>, vector<16x192xf32>
    %cst = arith.constant dense<0.000000e+00> : vector<64x192xf32>
    %2 = tpu.matmul %0, %1, %cst {dimension_numbers = #tpu.dot_dimension_numbers<[1], [0], [0], [1], [0, 0, 1, 1], [], []>} : vector<64x16xf32>, vector<16x192xf32>, vector<64x192xf32> -> vector<64x192xf32>
    %c0_3 = arith.constant 0 : index
    %c0_4 = arith.constant 0 : index
    %3 = vector.load %arg2[%c0_3, %c0_4] : memref<1x192xf32, #tpu.memory_space<vmem>>, vector<1x192xf32>
    %4 = vector.broadcast %3 : vector<1x192xf32> to vector<64x192xf32>
    %5 = arith.addf %2, %4 : vector<64x192xf32>
    %c0_5 = arith.constant 0 : index
    %c0_6 = arith.constant 0 : index
    %6 = vector.load %arg7[%c0_5, %c0_6] : memref<64x192xf32, #tpu.memory_space<vmem>>, vector<64x192xf32>
    tpu.vector_store %arg7[%c0_5, %c0_6], %5 {strides = array<i32>} : memref<64x192xf32, #tpu.memory_space<vmem>>, vector<64x192xf32>,
    %c0_7 = arith.constant 0 : index
    %c0_8 = arith.constant 0 : index
    %7 = vector.load %arg3[%c0_7, %c0_8] : memref<32x96xf32, #tpu.memory_space<vmem>>, vector<32x96xf32>
    %c0_9 = arith.constant 0 : index
    %c0_10 = arith.constant 0 : index
    %8 = vector.load %arg4[%c0_9, %c0_10] : memref<32x96xf32, #tpu.memory_space<vmem>>, vector<32x96xf32>
    %c0_11 = arith.constant 0 : index
    %c0_12 = arith.constant 0 : index
    %9 = vector.load %arg5[%c0_11, %c0_12] : memref<1x64xf32, #tpu.memory_space<vmem>>, vector<1x32xf32>
    %c0_13 = arith.constant 0 : index
    %c32 = arith.constant 32 : index
    %10 = vector.load %arg5[%c0_13, %c32] : memref<1x64xf32, #tpu.memory_space<vmem>>, vector<1x32xf32>
    %cst_14 = arith.constant 0.000000e+00 : f32
    %11 = vector.broadcast %cst_14 : f32 to vector<8x32xf32>
    %c0_i32 = arith.constant 0 : i32
    %c7_i32 = arith.constant 7 : i32
    %12 = arith.subi %c7_i32, %c0_i32 : i32
    %c8_i32 = arith.constant 8 : i32
    %13 = arith.muli %c0_i32, %c8_i32 : i32
    %14 = tpu.assume_multiple %13, 8 : i32
    %c8_i32_15 = arith.constant 8 : i32
    %15 = arith.muli %12, %c8_i32_15 : i32
    %16 = tpu.assume_multiple %15, 8 : i32
    %17 = arith.index_cast %14 : i32 to index
    %c0_16 = arith.constant 0 : index
    %18 = vector.load %arg7[%17, %c0_16] : memref<64x192xf32, #tpu.memory_space<vmem>>, vector<8x192xf32>
    %19 = vector.extract_strided_slice %18 {offsets = [0, 0], sizes = [8, 96], strides = [1, 1]} : vector<8x192xf32> to vector<8x96xf32>
    %20 = arith.index_cast %16 : i32 to index
    %c0_17 = arith.constant 0 : index
    %21 = vector.load %arg7[%20, %c0_17] : memref<64x192xf32, #tpu.memory_space<vmem>>, vector<8x192xf32>
    %22 = vector.extract_strided_slice %21 {offsets = [0, 96], sizes = [8, 96], strides = [1, 1]} : vector<8x192xf32> to vector<8x96xf32>
    %cst_18 = arith.constant dense<0.000000e+00> : vector<8x96xf32>
    %23 = tpu.matmul %11, %7, %cst_18 {dimension_numbers = #tpu.dot_dimension_numbers<[1], [0], [0], [1], [0, 0, 1, 1], [], []>} : vector<8x32xf32>, vector<32x96xf32>, vector<8x96xf32> -> vector<8x96xf32>
    %cst_19 = arith.constant dense<0.000000e+00> : vector<8x96xf32>
    %24 = tpu.matmul %11, %8, %cst_19 {dimension_numbers = #tpu.dot_dimension_numbers<[1], [0], [0], [1], [0, 0, 1, 1], [], []>} : vector<8x32xf32>, vector<32x96xf32>, vector<8x96xf32> -> vector<8x96xf32>
    %25 = vector.extract_strided_slice %19 {offsets = [0, 0], sizes = [8, 32], strides = [1, 1]} : vector<8x96xf32> to vector<8x32xf32>
    %26 = vector.extract_strided_slice %23 {offsets = [0, 0], sizes = [8, 32], strides = [1, 1]} : vector<8x96xf32> to vector<8x32xf32>
    %27 = arith.addf %25, %26 : vector<8x32xf32>
    %28 = arith.negf %27 : vector<8x32xf32>
    %29 = math.exp %28 : vector<8x32xf32>
    %cst_20 = arith.constant 1.000000e+00 : f32
    %30 = vector.broadcast %cst_20 : f32 to vector<8x32xf32>
    %31 = arith.addf %30, %29 : vector<8x32xf32>
    %32 = arith.divf %30, %31 : vector<8x32xf32>
    %33 = vector.extract_strided_slice %19 {offsets = [0, 32], sizes = [8, 32], strides = [1, 1]} : vector<8x96xf32> to vector<8x32xf32>
    %34 = vector.extract_strided_slice %23 {offsets = [0, 32], sizes = [8, 32], strides = [1, 1]} : vector<8x96xf32> to vector<8x32xf32>
    %35 = arith.addf %33, %34 : vector<8x32xf32>
    %36 = arith.negf %35 : vector<8x32xf32>
    %37 = math.exp %36 : vector<8x32xf32>
    %cst_21 = arith.constant 1.000000e+00 : f32
    %38 = vector.broadcast %cst_21 : f32 to vector<8x32xf32>
    %39 = arith.addf %38, %37 : vector<8x32xf32>
    %40 = arith.divf %38, %39 : vector<8x32xf32>
    %41 = vector.extract_strided_slice %19 {offsets = [0, 64], sizes = [8, 32], strides = [1, 1]} : vector<8x96xf32> to vector<8x32xf32>
    %42 = vector.extract_strided_slice %23 {offsets = [0, 64], sizes = [8, 32], strides = [1, 1]} : vector<8x96xf32> to vector<8x32xf32>
    %43 = vector.broadcast %9 : vector<1x32xf32> to vector<8x32xf32>
    %44 = arith.addf %42, %43 : vector<8x32xf32>
    %45 = arith.mulf %32, %44 : vector<8x32xf32>
    %46 = arith.addf %41, %45 : vector<8x32xf32>
    %47 = math.tanh %46 : vector<8x32xf32>
    %cst_22 = arith.constant 1.000000e+00 : f32
    %48 = vector.broadcast %cst_22 : f32 to vector<8x32xf32>
    %49 = arith.subf %48, %40 : vector<8x32xf32>
    %50 = arith.mulf %49, %47 : vector<8x32xf32>
    %51 = arith.mulf %40, %11 : vector<8x32xf32>
    %52 = arith.addf %50, %51 : vector<8x32xf32>
    %53 = vector.extract_strided_slice %22 {offsets = [0, 0], sizes = [8, 32], strides = [1, 1]} : vector<8x96xf32> to vector<8x32xf32>
    %54 = vector.extract_strided_slice %24 {offsets = [0, 0], sizes = [8, 32], strides = [1, 1]} : vector<8x96xf32> to vector<8x32xf32>
    %55 = arith.addf %53, %54 : vector<8x32xf32>
    %56 = arith.negf %55 : vector<8x32xf32>
    %57 = math.exp %56 : vector<8x32xf32>
    %cst_23 = arith.constant 1.000000e+00 : f32
    %58 = vector.broadcast %cst_23 : f32 to vector<8x32xf32>
    %59 = arith.addf %58, %57 : vector<8x32xf32>
    %60 = arith.divf %58, %59 : vector<8x32xf32>
    %61 = vector.extract_strided_slice %22 {offsets = [0, 32], sizes = [8, 32], strides = [1, 1]} : vector<8x96xf32> to vector<8x32xf32>
    %62 = vector.extract_strided_slice %24 {offsets = [0, 32], sizes = [8, 32], strides = [1, 1]} : vector<8x96xf32> to vector<8x32xf32>
    %63 = arith.addf %61, %62 : vector<8x32xf32>
    %64 = arith.negf %63 : vector<8x32xf32>
    %65 = math.exp %64 : vector<8x32xf32>
    %cst_24 = arith.constant 1.000000e+00 : f32
    %66 = vector.broadcast %cst_24 : f32 to vector<8x32xf32>
    %67 = arith.addf %66, %65 : vector<8x32xf32>
    %68 = arith.divf %66, %67 : vector<8x32xf32>
    %69 = vector.extract_strided_slice %22 {offsets = [0, 64], sizes = [8, 32], strides = [1, 1]} : vector<8x96xf32> to vector<8x32xf32>
    %70 = vector.extract_strided_slice %24 {offsets = [0, 64], sizes = [8, 32], strides = [1, 1]} : vector<8x96xf32> to vector<8x32xf32>
    %71 = vector.broadcast %10 : vector<1x32xf32> to vector<8x32xf32>
    %72 = arith.addf %70, %71 : vector<8x32xf32>
    %73 = arith.mulf %60, %72 : vector<8x32xf32>
    %74 = arith.addf %69, %73 : vector<8x32xf32>
    %75 = math.tanh %74 : vector<8x32xf32>
    %cst_25 = arith.constant 1.000000e+00 : f32
    %76 = vector.broadcast %cst_25 : f32 to vector<8x32xf32>
    %77 = arith.subf %76, %68 : vector<8x32xf32>
    %78 = arith.mulf %77, %75 : vector<8x32xf32>
    %79 = arith.mulf %68, %11 : vector<8x32xf32>
    %80 = arith.addf %78, %79 : vector<8x32xf32>
    %81 = arith.index_cast %c0_i32 : i32 to index
    %c0_26 = arith.constant 0 : index
    %c0_27 = arith.constant 0 : index
    %82 = vector.load %arg6[%81, %c0_26, %c0_27] : memref<8x8x64xf32, #tpu.memory_space<vmem>>, vector<1x8x32xf32>
    %83 = vector.shape_cast %82 : vector<1x8x32xf32> to vector<8x32xf32>
    %84 = vector.shape_cast %52 : vector<8x32xf32> to vector<1x8x32xf32>
    tpu.vector_store %arg6[%81, %c0_26, %c0_27], %84 {strides = array<i32>} : memref<8x8x64xf32, #tpu.memory_space<vmem>>, vector<1x8x32xf32>,
    %85 = arith.index_cast %12 : i32 to index
    %c0_28 = arith.constant 0 : index
    %c32_29 = arith.constant 32 : index
    %86 = vector.load %arg6[%85, %c0_28, %c32_29] : memref<8x8x64xf32, #tpu.memory_space<vmem>>, vector<1x8x32xf32>
    %87 = vector.shape_cast %86 : vector<1x8x32xf32> to vector<8x32xf32>
    %88 = vector.shape_cast %80 : vector<8x32xf32> to vector<1x8x32xf32>
    tpu.vector_store %arg6[%85, %c0_28, %c32_29], %88 {strides = array<i32>} : memref<8x8x64xf32, #tpu.memory_space<vmem>>, vector<1x8x32xf32>,
    %c1_i32 = arith.constant 1 : i32
    %c7_i32_30 = arith.constant 7 : i32
    %89 = arith.subi %c7_i32_30, %c1_i32 : i32
    %c8_i32_31 = arith.constant 8 : i32
    %90 = arith.muli %c1_i32, %c8_i32_31 : i32
    %91 = tpu.assume_multiple %90, 8 : i32
    %c8_i32_32 = arith.constant 8 : i32
    %92 = arith.muli %89, %c8_i32_32 : i32
    %93 = tpu.assume_multiple %92, 8 : i32
    %94 = arith.index_cast %91 : i32 to index
    %c0_33 = arith.constant 0 : index
    %95 = vector.load %arg7[%94, %c0_33] : memref<64x192xf32, #tpu.memory_space<vmem>>, vector<8x192xf32>
    %96 = vector.extract_strided_slice %95 {offsets = [0, 0], sizes = [8, 96], strides = [1, 1]} : vector<8x192xf32> to vector<8x96xf32>
    %97 = arith.index_cast %93 : i32 to index
    %c0_34 = arith.constant 0 : index
    %98 = vector.load %arg7[%97, %c0_34] : memref<64x192xf32, #tpu.memory_space<vmem>>, vector<8x192xf32>
    %99 = vector.extract_strided_slice %98 {offsets = [0, 96], sizes = [8, 96], strides = [1, 1]} : vector<8x192xf32> to vector<8x96xf32>
    %cst_35 = arith.constant dense<0.000000e+00> : vector<8x96xf32>
    %100 = tpu.matmul %52, %7, %cst_35 {dimension_numbers = #tpu.dot_dimension_numbers<[1], [0], [0], [1], [0, 0, 1, 1], [], []>} : vector<8x32xf32>, vector<32x96xf32>, vector<8x96xf32> -> vector<8x96xf32>
    %cst_36 = arith.constant dense<0.000000e+00> : vector<8x96xf32>
    %101 = tpu.matmul %80, %8, %cst_36 {dimension_numbers = #tpu.dot_dimension_numbers<[1], [0], [0], [1], [0, 0, 1, 1], [], []>} : vector<8x32xf32>, vector<32x96xf32>, vector<8x96xf32> -> vector<8x96xf32>
    %102 = vector.extract_strided_slice %96 {offsets = [0, 0], sizes = [8, 32], strides = [1, 1]} : vector<8x96xf32> to vector<8x32xf32>
    %103 = vector.extract_strided_slice %100 {offsets = [0, 0], sizes = [8, 32], strides = [1, 1]} : vector<8x96xf32> to vector<8x32xf32>
    %104 = arith.addf %102, %103 : vector<8x32xf32>
    %105 = arith.negf %104 : vector<8x32xf32>
    %106 = math.exp %105 : vector<8x32xf32>
    %cst_37 = arith.constant 1.000000e+00 : f32
    %107 = vector.broadcast %cst_37 : f32 to vector<8x32xf32>
    %108 = arith.addf %107, %106 : vector<8x32xf32>
    %109 = arith.divf %107, %108 : vector<8x32xf32>
    %110 = vector.extract_strided_slice %96 {offsets = [0, 32], sizes = [8, 32], strides = [1, 1]} : vector<8x96xf32> to vector<8x32xf32>
    %111 = vector.extract_strided_slice %100 {offsets = [0, 32], sizes = [8, 32], strides = [1, 1]} : vector<8x96xf32> to vector<8x32xf32>
    %112 = arith.addf %110, %111 : vector<8x32xf32>
    %113 = arith.negf %112 : vector<8x32xf32>
    %114 = math.exp %113 : vector<8x32xf32>
    %cst_38 = arith.constant 1.000000e+00 : f32
    %115 = vector.broadcast %cst_38 : f32 to vector<8x32xf32>
    %116 = arith.addf %115, %114 : vector<8x32xf32>
    %117 = arith.divf %115, %116 : vector<8x32xf32>
    %118 = vector.extract_strided_slice %96 {offsets = [0, 64], sizes = [8, 32], strides = [1, 1]} : vector<8x96xf32> to vector<8x32xf32>
    %119 = vector.extract_strided_slice %100 {offsets = [0, 64], sizes = [8, 32], strides = [1, 1]} : vector<8x96xf32> to vector<8x32xf32>
    %120 = vector.broadcast %9 : vector<1x32xf32> to vector<8x32xf32>
    %121 = arith.addf %119, %120 : vector<8x32xf32>
    %122 = arith.mulf %109, %121 : vector<8x32xf32>
    %123 = arith.addf %118, %122 : vector<8x32xf32>
    %124 = math.tanh %123 : vector<8x32xf32>
    %cst_39 = arith.constant 1.000000e+00 : f32
    %125 = vector.broadcast %cst_39 : f32 to vector<8x32xf32>
    %126 = arith.subf %125, %117 : vector<8x32xf32>
    %127 = arith.mulf %126, %124 : vector<8x32xf32>
    %128 = arith.mulf %117, %52 : vector<8x32xf32>
    %129 = arith.addf %127, %128 : vector<8x32xf32>
    %130 = vector.extract_strided_slice %99 {offsets = [0, 0], sizes = [8, 32], strides = [1, 1]} : vector<8x96xf32> to vector<8x32xf32>
    %131 = vector.extract_strided_slice %101 {offsets = [0, 0], sizes = [8, 32], strides = [1, 1]} : vector<8x96xf32> to vector<8x32xf32>
    %132 = arith.addf %130, %131 : vector<8x32xf32>
    %133 = arith.negf %132 : vector<8x32xf32>
    %134 = math.exp %133 : vector<8x32xf32>
    %cst_40 = arith.constant 1.000000e+00 : f32
    %135 = vector.broadcast %cst_40 : f32 to vector<8x32xf32>
    %136 = arith.addf %135, %134 : vector<8x32xf32>
    %137 = arith.divf %135, %136 : vector<8x32xf32>
    %138 = vector.extract_strided_slice %99 {offsets = [0, 32], sizes = [8, 32], strides = [1, 1]} : vector<8x96xf32> to vector<8x32xf32>
    %139 = vector.extract_strided_slice %101 {offsets = [0, 32], sizes = [8, 32], strides = [1, 1]} : vector<8x96xf32> to vector<8x32xf32>
    %140 = arith.addf %138, %139 : vector<8x32xf32>
    %141 = arith.negf %140 : vector<8x32xf32>
    %142 = math.exp %141 : vector<8x32xf32>
    %cst_41 = arith.constant 1.000000e+00 : f32
    %143 = vector.broadcast %cst_41 : f32 to vector<8x32xf32>
    %144 = arith.addf %143, %142 : vector<8x32xf32>
    %145 = arith.divf %143, %144 : vector<8x32xf32>
    %146 = vector.extract_strided_slice %99 {offsets = [0, 64], sizes = [8, 32], strides = [1, 1]} : vector<8x96xf32> to vector<8x32xf32>
    %147 = vector.extract_strided_slice %101 {offsets = [0, 64], sizes = [8, 32], strides = [1, 1]} : vector<8x96xf32> to vector<8x32xf32>
    %148 = vector.broadcast %10 : vector<1x32xf32> to vector<8x32xf32>
    %149 = arith.addf %147, %148 : vector<8x32xf32>
    %150 = arith.mulf %137, %149 : vector<8x32xf32>
    %151 = arith.addf %146, %150 : vector<8x32xf32>
    %152 = math.tanh %151 : vector<8x32xf32>
    %cst_42 = arith.constant 1.000000e+00 : f32
    %153 = vector.broadcast %cst_42 : f32 to vector<8x32xf32>
    %154 = arith.subf %153, %145 : vector<8x32xf32>
    %155 = arith.mulf %154, %152 : vector<8x32xf32>
    %156 = arith.mulf %145, %80 : vector<8x32xf32>
    %157 = arith.addf %155, %156 : vector<8x32xf32>
    %158 = arith.index_cast %c1_i32 : i32 to index
    %c0_43 = arith.constant 0 : index
    %c0_44 = arith.constant 0 : index
    %159 = vector.load %arg6[%158, %c0_43, %c0_44] : memref<8x8x64xf32, #tpu.memory_space<vmem>>, vector<1x8x32xf32>
    %160 = vector.shape_cast %159 : vector<1x8x32xf32> to vector<8x32xf32>
    %161 = vector.shape_cast %129 : vector<8x32xf32> to vector<1x8x32xf32>
    tpu.vector_store %arg6[%158, %c0_43, %c0_44], %161 {strides = array<i32>} : memref<8x8x64xf32, #tpu.memory_space<vmem>>, vector<1x8x32xf32>,
    %162 = arith.index_cast %89 : i32 to index
    %c0_45 = arith.constant 0 : index
    %c32_46 = arith.constant 32 : index
    %163 = vector.load %arg6[%162, %c0_45, %c32_46] : memref<8x8x64xf32, #tpu.memory_space<vmem>>, vector<1x8x32xf32>
    %164 = vector.shape_cast %163 : vector<1x8x32xf32> to vector<8x32xf32>
    %165 = vector.shape_cast %157 : vector<8x32xf32> to vector<1x8x32xf32>
    tpu.vector_store %arg6[%162, %c0_45, %c32_46], %165 {strides = array<i32>} : memref<8x8x64xf32, #tpu.memory_space<vmem>>, vector<1x8x32xf32>,
    %c2_i32 = arith.constant 2 : i32
    %c7_i32_47 = arith.constant 7 : i32
    %166 = arith.subi %c7_i32_47, %c2_i32 : i32
    %c8_i32_48 = arith.constant 8 : i32
    %167 = arith.muli %c2_i32, %c8_i32_48 : i32
    %168 = tpu.assume_multiple %167, 8 : i32
    %c8_i32_49 = arith.constant 8 : i32
    %169 = arith.muli %166, %c8_i32_49 : i32
    %170 = tpu.assume_multiple %169, 8 : i32
    %171 = arith.index_cast %168 : i32 to index
    %c0_50 = arith.constant 0 : index
    %172 = vector.load %arg7[%171, %c0_50] : memref<64x192xf32, #tpu.memory_space<vmem>>, vector<8x192xf32>
    %173 = vector.extract_strided_slice %172 {offsets = [0, 0], sizes = [8, 96], strides = [1, 1]} : vector<8x192xf32> to vector<8x96xf32>
    %174 = arith.index_cast %170 : i32 to index
    %c0_51 = arith.constant 0 : index
    %175 = vector.load %arg7[%174, %c0_51] : memref<64x192xf32, #tpu.memory_space<vmem>>, vector<8x192xf32>
    %176 = vector.extract_strided_slice %175 {offsets = [0, 96], sizes = [8, 96], strides = [1, 1]} : vector<8x192xf32> to vector<8x96xf32>
    %cst_52 = arith.constant dense<0.000000e+00> : vector<8x96xf32>
    %177 = tpu.matmul %129, %7, %cst_52 {dimension_numbers = #tpu.dot_dimension_numbers<[1], [0], [0], [1], [0, 0, 1, 1], [], []>} : vector<8x32xf32>, vector<32x96xf32>, vector<8x96xf32> -> vector<8x96xf32>
    %cst_53 = arith.constant dense<0.000000e+00> : vector<8x96xf32>
    %178 = tpu.matmul %157, %8, %cst_53 {dimension_numbers = #tpu.dot_dimension_numbers<[1], [0], [0], [1], [0, 0, 1, 1], [], []>} : vector<8x32xf32>, vector<32x96xf32>, vector<8x96xf32> -> vector<8x96xf32>
    %179 = vector.extract_strided_slice %173 {offsets = [0, 0], sizes = [8, 32], strides = [1, 1]} : vector<8x96xf32> to vector<8x32xf32>
    %180 = vector.extract_strided_slice %177 {offsets = [0, 0], sizes = [8, 32], strides = [1, 1]} : vector<8x96xf32> to vector<8x32xf32>
    %181 = arith.addf %179, %180 : vector<8x32xf32>
    %182 = arith.negf %181 : vector<8x32xf32>
    %183 = math.exp %182 : vector<8x32xf32>
    %cst_54 = arith.constant 1.000000e+00 : f32
    %184 = vector.broadcast %cst_54 : f32 to vector<8x32xf32>
    %185 = arith.addf %184, %183 : vector<8x32xf32>
    %186 = arith.divf %184, %185 : vector<8x32xf32>
    %187 = vector.extract_strided_slice %173 {offsets = [0, 32], sizes = [8, 32], strides = [1, 1]} : vector<8x96xf32> to vector<8x32xf32>
    %188 = vector.extract_strided_slice %177 {offsets = [0, 32], sizes = [8, 32], strides = [1, 1]} : vector<8x96xf32> to vector<8x32xf32>
    %189 = arith.addf %187, %188 : vector<8x32xf32>
    %190 = arith.negf %189 : vector<8x32xf32>
    %191 = math.exp %190 : vector<8x32xf32>
    %cst_55 = arith.constant 1.000000e+00 : f32
    %192 = vector.broadcast %cst_55 : f32 to vector<8x32xf32>
    %193 = arith.addf %192, %191 : vector<8x32xf32>
    %194 = arith.divf %192, %193 : vector<8x32xf32>
    %195 = vector.extract_strided_slice %173 {offsets = [0, 64], sizes = [8, 32], strides = [1, 1]} : vector<8x96xf32> to vector<8x32xf32>
    %196 = vector.extract_strided_slice %177 {offsets = [0, 64], sizes = [8, 32], strides = [1, 1]} : vector<8x96xf32> to vector<8x32xf32>
    %197 = vector.broadcast %9 : vector<1x32xf32> to vector<8x32xf32>
    %198 = arith.addf %196, %197 : vector<8x32xf32>
    %199 = arith.mulf %186, %198 : vector<8x32xf32>
    %200 = arith.addf %195, %199 : vector<8x32xf32>
    %201 = math.tanh %200 : vector<8x32xf32>
    %cst_56 = arith.constant 1.000000e+00 : f32
    %202 = vector.broadcast %cst_56 : f32 to vector<8x32xf32>
    %203 = arith.subf %202, %194 : vector<8x32xf32>
    %204 = arith.mulf %203, %201 : vector<8x32xf32>
    %205 = arith.mulf %194, %129 : vector<8x32xf32>
    %206 = arith.addf %204, %205 : vector<8x32xf32>
    %207 = vector.extract_strided_slice %176 {offsets = [0, 0], sizes = [8, 32], strides = [1, 1]} : vector<8x96xf32> to vector<8x32xf32>
    %208 = vector.extract_strided_slice %178 {offsets = [0, 0], sizes = [8, 32], strides = [1, 1]} : vector<8x96xf32> to vector<8x32xf32>
    %209 = arith.addf %207, %208 : vector<8x32xf32>
    %210 = arith.negf %209 : vector<8x32xf32>
    %211 = math.exp %210 : vector<8x32xf32>
    %cst_57 = arith.constant 1.000000e+00 : f32
    %212 = vector.broadcast %cst_57 : f32 to vector<8x32xf32>
    %213 = arith.addf %212, %211 : vector<8x32xf32>
    %214 = arith.divf %212, %213 : vector<8x32xf32>
    %215 = vector.extract_strided_slice %176 {offsets = [0, 32], sizes = [8, 32], strides = [1, 1]} : vector<8x96xf32> to vector<8x32xf32>
    %216 = vector.extract_strided_slice %178 {offsets = [0, 32], sizes = [8, 32], strides = [1, 1]} : vector<8x96xf32> to vector<8x32xf32>
    %217 = arith.addf %215, %216 : vector<8x32xf32>
    %218 = arith.negf %217 : vector<8x32xf32>
    %219 = math.exp %218 : vector<8x32xf32>
    %cst_58 = arith.constant 1.000000e+00 : f32
    %220 = vector.broadcast %cst_58 : f32 to vector<8x32xf32>
    %221 = arith.addf %220, %219 : vector<8x32xf32>
    %222 = arith.divf %220, %221 : vector<8x32xf32>
    %223 = vector.extract_strided_slice %176 {offsets = [0, 64], sizes = [8, 32], strides = [1, 1]} : vector<8x96xf32> to vector<8x32xf32>
    %224 = vector.extract_strided_slice %178 {offsets = [0, 64], sizes = [8, 32], strides = [1, 1]} : vector<8x96xf32> to vector<8x32xf32>
    %225 = vector.broadcast %10 : vector<1x32xf32> to vector<8x32xf32>
    %226 = arith.addf %224, %225 : vector<8x32xf32>
    %227 = arith.mulf %214, %226 : vector<8x32xf32>
    %228 = arith.addf %223, %227 : vector<8x32xf32>
    %229 = math.tanh %228 : vector<8x32xf32>
    %cst_59 = arith.constant 1.000000e+00 : f32
    %230 = vector.broadcast %cst_59 : f32 to vector<8x32xf32>
    %231 = arith.subf %230, %222 : vector<8x32xf32>
    %232 = arith.mulf %231, %229 : vector<8x32xf32>
    %233 = arith.mulf %222, %157 : vector<8x32xf32>
    %234 = arith.addf %232, %233 : vector<8x32xf32>
    %235 = arith.index_cast %c2_i32 : i32 to index
    %c0_60 = arith.constant 0 : index
    %c0_61 = arith.constant 0 : index
    %236 = vector.load %arg6[%235, %c0_60, %c0_61] : memref<8x8x64xf32, #tpu.memory_space<vmem>>, vector<1x8x32xf32>
    %237 = vector.shape_cast %236 : vector<1x8x32xf32> to vector<8x32xf32>
    %238 = vector.shape_cast %206 : vector<8x32xf32> to vector<1x8x32xf32>
    tpu.vector_store %arg6[%235, %c0_60, %c0_61], %238 {strides = array<i32>} : memref<8x8x64xf32, #tpu.memory_space<vmem>>, vector<1x8x32xf32>,
    %239 = arith.index_cast %166 : i32 to index
    %c0_62 = arith.constant 0 : index
    %c32_63 = arith.constant 32 : index
    %240 = vector.load %arg6[%239, %c0_62, %c32_63] : memref<8x8x64xf32, #tpu.memory_space<vmem>>, vector<1x8x32xf32>
    %241 = vector.shape_cast %240 : vector<1x8x32xf32> to vector<8x32xf32>
    %242 = vector.shape_cast %234 : vector<8x32xf32> to vector<1x8x32xf32>
    tpu.vector_store %arg6[%239, %c0_62, %c32_63], %242 {strides = array<i32>} : memref<8x8x64xf32, #tpu.memory_space<vmem>>, vector<1x8x32xf32>,
    %c3_i32 = arith.constant 3 : i32
    %c7_i32_64 = arith.constant 7 : i32
    %243 = arith.subi %c7_i32_64, %c3_i32 : i32
    %c8_i32_65 = arith.constant 8 : i32
    %244 = arith.muli %c3_i32, %c8_i32_65 : i32
    %245 = tpu.assume_multiple %244, 8 : i32
    %c8_i32_66 = arith.constant 8 : i32
    %246 = arith.muli %243, %c8_i32_66 : i32
    %247 = tpu.assume_multiple %246, 8 : i32
    %248 = arith.index_cast %245 : i32 to index
    %c0_67 = arith.constant 0 : index
    %249 = vector.load %arg7[%248, %c0_67] : memref<64x192xf32, #tpu.memory_space<vmem>>, vector<8x192xf32>
    %250 = vector.extract_strided_slice %249 {offsets = [0, 0], sizes = [8, 96], strides = [1, 1]} : vector<8x192xf32> to vector<8x96xf32>
    %251 = arith.index_cast %247 : i32 to index
    %c0_68 = arith.constant 0 : index
    %252 = vector.load %arg7[%251, %c0_68] : memref<64x192xf32, #tpu.memory_space<vmem>>, vector<8x192xf32>
    %253 = vector.extract_strided_slice %252 {offsets = [0, 96], sizes = [8, 96], strides = [1, 1]} : vector<8x192xf32> to vector<8x96xf32>
    %cst_69 = arith.constant dense<0.000000e+00> : vector<8x96xf32>
    %254 = tpu.matmul %206, %7, %cst_69 {dimension_numbers = #tpu.dot_dimension_numbers<[1], [0], [0], [1], [0, 0, 1, 1], [], []>} : vector<8x32xf32>, vector<32x96xf32>, vector<8x96xf32> -> vector<8x96xf32>
    %cst_70 = arith.constant dense<0.000000e+00> : vector<8x96xf32>
    %255 = tpu.matmul %234, %8, %cst_70 {dimension_numbers = #tpu.dot_dimension_numbers<[1], [0], [0], [1], [0, 0, 1, 1], [], []>} : vector<8x32xf32>, vector<32x96xf32>, vector<8x96xf32> -> vector<8x96xf32>
    %256 = vector.extract_strided_slice %250 {offsets = [0, 0], sizes = [8, 32], strides = [1, 1]} : vector<8x96xf32> to vector<8x32xf32>
    %257 = vector.extract_strided_slice %254 {offsets = [0, 0], sizes = [8, 32], strides = [1, 1]} : vector<8x96xf32> to vector<8x32xf32>
    %258 = arith.addf %256, %257 : vector<8x32xf32>
    %259 = arith.negf %258 : vector<8x32xf32>
    %260 = math.exp %259 : vector<8x32xf32>
    %cst_71 = arith.constant 1.000000e+00 : f32
    %261 = vector.broadcast %cst_71 : f32 to vector<8x32xf32>
    %262 = arith.addf %261, %260 : vector<8x32xf32>
    %263 = arith.divf %261, %262 : vector<8x32xf32>
    %264 = vector.extract_strided_slice %250 {offsets = [0, 32], sizes = [8, 32], strides = [1, 1]} : vector<8x96xf32> to vector<8x32xf32>
    %265 = vector.extract_strided_slice %254 {offsets = [0, 32], sizes = [8, 32], strides = [1, 1]} : vector<8x96xf32> to vector<8x32xf32>
    %266 = arith.addf %264, %265 : vector<8x32xf32>
    %267 = arith.negf %266 : vector<8x32xf32>
    %268 = math.exp %267 : vector<8x32xf32>
    %cst_72 = arith.constant 1.000000e+00 : f32
    %269 = vector.broadcast %cst_72 : f32 to vector<8x32xf32>
    %270 = arith.addf %269, %268 : vector<8x32xf32>
    %271 = arith.divf %269, %270 : vector<8x32xf32>
    %272 = vector.extract_strided_slice %250 {offsets = [0, 64], sizes = [8, 32], strides = [1, 1]} : vector<8x96xf32> to vector<8x32xf32>
    %273 = vector.extract_strided_slice %254 {offsets = [0, 64], sizes = [8, 32], strides = [1, 1]} : vector<8x96xf32> to vector<8x32xf32>
    %274 = vector.broadcast %9 : vector<1x32xf32> to vector<8x32xf32>
    %275 = arith.addf %273, %274 : vector<8x32xf32>
    %276 = arith.mulf %263, %275 : vector<8x32xf32>
    %277 = arith.addf %272, %276 : vector<8x32xf32>
    %278 = math.tanh %277 : vector<8x32xf32>
    %cst_73 = arith.constant 1.000000e+00 : f32
    %279 = vector.broadcast %cst_73 : f32 to vector<8x32xf32>
    %280 = arith.subf %279, %271 : vector<8x32xf32>
    %281 = arith.mulf %280, %278 : vector<8x32xf32>
    %282 = arith.mulf %271, %206 : vector<8x32xf32>
    %283 = arith.addf %281, %282 : vector<8x32xf32>
    %284 = vector.extract_strided_slice %253 {offsets = [0, 0], sizes = [8, 32], strides = [1, 1]} : vector<8x96xf32> to vector<8x32xf32>
    %285 = vector.extract_strided_slice %255 {offsets = [0, 0], sizes = [8, 32], strides = [1, 1]} : vector<8x96xf32> to vector<8x32xf32>
    %286 = arith.addf %284, %285 : vector<8x32xf32>
    %287 = arith.negf %286 : vector<8x32xf32>
    %288 = math.exp %287 : vector<8x32xf32>
    %cst_74 = arith.constant 1.000000e+00 : f32
    %289 = vector.broadcast %cst_74 : f32 to vector<8x32xf32>
    %290 = arith.addf %289, %288 : vector<8x32xf32>
    %291 = arith.divf %289, %290 : vector<8x32xf32>
    %292 = vector.extract_strided_slice %253 {offsets = [0, 32], sizes = [8, 32], strides = [1, 1]} : vector<8x96xf32> to vector<8x32xf32>
    %293 = vector.extract_strided_slice %255 {offsets = [0, 32], sizes = [8, 32], strides = [1, 1]} : vector<8x96xf32> to vector<8x32xf32>
    %294 = arith.addf %292, %293 : vector<8x32xf32>
    %295 = arith.negf %294 : vector<8x32xf32>
    %296 = math.exp %295 : vector<8x32xf32>
    %cst_75 = arith.constant 1.000000e+00 : f32
    %297 = vector.broadcast %cst_75 : f32 to vector<8x32xf32>
    %298 = arith.addf %297, %296 : vector<8x32xf32>
    %299 = arith.divf %297, %298 : vector<8x32xf32>
    %300 = vector.extract_strided_slice %253 {offsets = [0, 64], sizes = [8, 32], strides = [1, 1]} : vector<8x96xf32> to vector<8x32xf32>
    %301 = vector.extract_strided_slice %255 {offsets = [0, 64], sizes = [8, 32], strides = [1, 1]} : vector<8x96xf32> to vector<8x32xf32>
    %302 = vector.broadcast %10 : vector<1x32xf32> to vector<8x32xf32>
    %303 = arith.addf %301, %302 : vector<8x32xf32>
    %304 = arith.mulf %291, %303 : vector<8x32xf32>
    %305 = arith.addf %300, %304 : vector<8x32xf32>
    %306 = math.tanh %305 : vector<8x32xf32>
    %cst_76 = arith.constant 1.000000e+00 : f32
    %307 = vector.broadcast %cst_76 : f32 to vector<8x32xf32>
    %308 = arith.subf %307, %299 : vector<8x32xf32>
    %309 = arith.mulf %308, %306 : vector<8x32xf32>
    %310 = arith.mulf %299, %234 : vector<8x32xf32>
    %311 = arith.addf %309, %310 : vector<8x32xf32>
    %312 = arith.index_cast %c3_i32 : i32 to index
    %c0_77 = arith.constant 0 : index
    %c0_78 = arith.constant 0 : index
    %313 = vector.load %arg6[%312, %c0_77, %c0_78] : memref<8x8x64xf32, #tpu.memory_space<vmem>>, vector<1x8x32xf32>
    %314 = vector.shape_cast %313 : vector<1x8x32xf32> to vector<8x32xf32>
    %315 = vector.shape_cast %283 : vector<8x32xf32> to vector<1x8x32xf32>
    tpu.vector_store %arg6[%312, %c0_77, %c0_78], %315 {strides = array<i32>} : memref<8x8x64xf32, #tpu.memory_space<vmem>>, vector<1x8x32xf32>,
    %316 = arith.index_cast %243 : i32 to index
    %c0_79 = arith.constant 0 : index
    %c32_80 = arith.constant 32 : index
    %317 = vector.load %arg6[%316, %c0_79, %c32_80] : memref<8x8x64xf32, #tpu.memory_space<vmem>>, vector<1x8x32xf32>
    %318 = vector.shape_cast %317 : vector<1x8x32xf32> to vector<8x32xf32>
    %319 = vector.shape_cast %311 : vector<8x32xf32> to vector<1x8x32xf32>
    tpu.vector_store %arg6[%316, %c0_79, %c32_80], %319 {strides = array<i32>} : memref<8x8x64xf32, #tpu.memory_space<vmem>>, vector<1x8x32xf32>,
    %c4_i32 = arith.constant 4 : i32
    %c7_i32_81 = arith.constant 7 : i32
    %320 = arith.subi %c7_i32_81, %c4_i32 : i32
    %c8_i32_82 = arith.constant 8 : i32
    %321 = arith.muli %c4_i32, %c8_i32_82 : i32
    %322 = tpu.assume_multiple %321, 8 : i32
    %c8_i32_83 = arith.constant 8 : i32
    %323 = arith.muli %320, %c8_i32_83 : i32
    %324 = tpu.assume_multiple %323, 8 : i32
    %325 = arith.index_cast %322 : i32 to index
    %c0_84 = arith.constant 0 : index
    %326 = vector.load %arg7[%325, %c0_84] : memref<64x192xf32, #tpu.memory_space<vmem>>, vector<8x192xf32>
    %327 = vector.extract_strided_slice %326 {offsets = [0, 0], sizes = [8, 96], strides = [1, 1]} : vector<8x192xf32> to vector<8x96xf32>
    %328 = arith.index_cast %324 : i32 to index
    %c0_85 = arith.constant 0 : index
    %329 = vector.load %arg7[%328, %c0_85] : memref<64x192xf32, #tpu.memory_space<vmem>>, vector<8x192xf32>
    %330 = vector.extract_strided_slice %329 {offsets = [0, 96], sizes = [8, 96], strides = [1, 1]} : vector<8x192xf32> to vector<8x96xf32>
    %cst_86 = arith.constant dense<0.000000e+00> : vector<8x96xf32>
    %331 = tpu.matmul %283, %7, %cst_86 {dimension_numbers = #tpu.dot_dimension_numbers<[1], [0], [0], [1], [0, 0, 1, 1], [], []>} : vector<8x32xf32>, vector<32x96xf32>, vector<8x96xf32> -> vector<8x96xf32>
    %cst_87 = arith.constant dense<0.000000e+00> : vector<8x96xf32>
    %332 = tpu.matmul %311, %8, %cst_87 {dimension_numbers = #tpu.dot_dimension_numbers<[1], [0], [0], [1], [0, 0, 1, 1], [], []>} : vector<8x32xf32>, vector<32x96xf32>, vector<8x96xf32> -> vector<8x96xf32>
    %333 = vector.extract_strided_slice %327 {offsets = [0, 0], sizes = [8, 32], strides = [1, 1]} : vector<8x96xf32> to vector<8x32xf32>
    %334 = vector.extract_strided_slice %331 {offsets = [0, 0], sizes = [8, 32], strides = [1, 1]} : vector<8x96xf32> to vector<8x32xf32>
    %335 = arith.addf %333, %334 : vector<8x32xf32>
    %336 = arith.negf %335 : vector<8x32xf32>
    %337 = math.exp %336 : vector<8x32xf32>
    %cst_88 = arith.constant 1.000000e+00 : f32
    %338 = vector.broadcast %cst_88 : f32 to vector<8x32xf32>
    %339 = arith.addf %338, %337 : vector<8x32xf32>
    %340 = arith.divf %338, %339 : vector<8x32xf32>
    %341 = vector.extract_strided_slice %327 {offsets = [0, 32], sizes = [8, 32], strides = [1, 1]} : vector<8x96xf32> to vector<8x32xf32>
    %342 = vector.extract_strided_slice %331 {offsets = [0, 32], sizes = [8, 32], strides = [1, 1]} : vector<8x96xf32> to vector<8x32xf32>
    %343 = arith.addf %341, %342 : vector<8x32xf32>
    %344 = arith.negf %343 : vector<8x32xf32>
    %345 = math.exp %344 : vector<8x32xf32>
    %cst_89 = arith.constant 1.000000e+00 : f32
    %346 = vector.broadcast %cst_89 : f32 to vector<8x32xf32>
    %347 = arith.addf %346, %345 : vector<8x32xf32>
    %348 = arith.divf %346, %347 : vector<8x32xf32>
    %349 = vector.extract_strided_slice %327 {offsets = [0, 64], sizes = [8, 32], strides = [1, 1]} : vector<8x96xf32> to vector<8x32xf32>
    %350 = vector.extract_strided_slice %331 {offsets = [0, 64], sizes = [8, 32], strides = [1, 1]} : vector<8x96xf32> to vector<8x32xf32>
    %351 = vector.broadcast %9 : vector<1x32xf32> to vector<8x32xf32>
    %352 = arith.addf %350, %351 : vector<8x32xf32>
    %353 = arith.mulf %340, %352 : vector<8x32xf32>
    %354 = arith.addf %349, %353 : vector<8x32xf32>
    %355 = math.tanh %354 : vector<8x32xf32>
    %cst_90 = arith.constant 1.000000e+00 : f32
    %356 = vector.broadcast %cst_90 : f32 to vector<8x32xf32>
    %357 = arith.subf %356, %348 : vector<8x32xf32>
    %358 = arith.mulf %357, %355 : vector<8x32xf32>
    %359 = arith.mulf %348, %283 : vector<8x32xf32>
    %360 = arith.addf %358, %359 : vector<8x32xf32>
    %361 = vector.extract_strided_slice %330 {offsets = [0, 0], sizes = [8, 32], strides = [1, 1]} : vector<8x96xf32> to vector<8x32xf32>
    %362 = vector.extract_strided_slice %332 {offsets = [0, 0], sizes = [8, 32], strides = [1, 1]} : vector<8x96xf32> to vector<8x32xf32>
    %363 = arith.addf %361, %362 : vector<8x32xf32>
    %364 = arith.negf %363 : vector<8x32xf32>
    %365 = math.exp %364 : vector<8x32xf32>
    %cst_91 = arith.constant 1.000000e+00 : f32
    %366 = vector.broadcast %cst_91 : f32 to vector<8x32xf32>
    %367 = arith.addf %366, %365 : vector<8x32xf32>
    %368 = arith.divf %366, %367 : vector<8x32xf32>
    %369 = vector.extract_strided_slice %330 {offsets = [0, 32], sizes = [8, 32], strides = [1, 1]} : vector<8x96xf32> to vector<8x32xf32>
    %370 = vector.extract_strided_slice %332 {offsets = [0, 32], sizes = [8, 32], strides = [1, 1]} : vector<8x96xf32> to vector<8x32xf32>
    %371 = arith.addf %369, %370 : vector<8x32xf32>
    %372 = arith.negf %371 : vector<8x32xf32>
    %373 = math.exp %372 : vector<8x32xf32>
    %cst_92 = arith.constant 1.000000e+00 : f32
    %374 = vector.broadcast %cst_92 : f32 to vector<8x32xf32>
    %375 = arith.addf %374, %373 : vector<8x32xf32>
    %376 = arith.divf %374, %375 : vector<8x32xf32>
    %377 = vector.extract_strided_slice %330 {offsets = [0, 64], sizes = [8, 32], strides = [1, 1]} : vector<8x96xf32> to vector<8x32xf32>
    %378 = vector.extract_strided_slice %332 {offsets = [0, 64], sizes = [8, 32], strides = [1, 1]} : vector<8x96xf32> to vector<8x32xf32>
    %379 = vector.broadcast %10 : vector<1x32xf32> to vector<8x32xf32>
    %380 = arith.addf %378, %379 : vector<8x32xf32>
    %381 = arith.mulf %368, %380 : vector<8x32xf32>
    %382 = arith.addf %377, %381 : vector<8x32xf32>
    %383 = math.tanh %382 : vector<8x32xf32>
    %cst_93 = arith.constant 1.000000e+00 : f32
    %384 = vector.broadcast %cst_93 : f32 to vector<8x32xf32>
    %385 = arith.subf %384, %376 : vector<8x32xf32>
    %386 = arith.mulf %385, %383 : vector<8x32xf32>
    %387 = arith.mulf %376, %311 : vector<8x32xf32>
    %388 = arith.addf %386, %387 : vector<8x32xf32>
    %389 = arith.index_cast %c4_i32 : i32 to index
    %c0_94 = arith.constant 0 : index
    %c0_95 = arith.constant 0 : index
    %390 = vector.load %arg6[%389, %c0_94, %c0_95] : memref<8x8x64xf32, #tpu.memory_space<vmem>>, vector<1x8x32xf32>
    %391 = vector.shape_cast %390 : vector<1x8x32xf32> to vector<8x32xf32>
    %392 = vector.shape_cast %360 : vector<8x32xf32> to vector<1x8x32xf32>
    tpu.vector_store %arg6[%389, %c0_94, %c0_95], %392 {strides = array<i32>} : memref<8x8x64xf32, #tpu.memory_space<vmem>>, vector<1x8x32xf32>,
    %393 = arith.index_cast %320 : i32 to index
    %c0_96 = arith.constant 0 : index
    %c32_97 = arith.constant 32 : index
    %394 = vector.load %arg6[%393, %c0_96, %c32_97] : memref<8x8x64xf32, #tpu.memory_space<vmem>>, vector<1x8x32xf32>
    %395 = vector.shape_cast %394 : vector<1x8x32xf32> to vector<8x32xf32>
    %396 = vector.shape_cast %388 : vector<8x32xf32> to vector<1x8x32xf32>
    tpu.vector_store %arg6[%393, %c0_96, %c32_97], %396 {strides = array<i32>} : memref<8x8x64xf32, #tpu.memory_space<vmem>>, vector<1x8x32xf32>,
    %c5_i32 = arith.constant 5 : i32
    %c7_i32_98 = arith.constant 7 : i32
    %397 = arith.subi %c7_i32_98, %c5_i32 : i32
    %c8_i32_99 = arith.constant 8 : i32
    %398 = arith.muli %c5_i32, %c8_i32_99 : i32
    %399 = tpu.assume_multiple %398, 8 : i32
    %c8_i32_100 = arith.constant 8 : i32
    %400 = arith.muli %397, %c8_i32_100 : i32
    %401 = tpu.assume_multiple %400, 8 : i32
    %402 = arith.index_cast %399 : i32 to index
    %c0_101 = arith.constant 0 : index
    %403 = vector.load %arg7[%402, %c0_101] : memref<64x192xf32, #tpu.memory_space<vmem>>, vector<8x192xf32>
    %404 = vector.extract_strided_slice %403 {offsets = [0, 0], sizes = [8, 96], strides = [1, 1]} : vector<8x192xf32> to vector<8x96xf32>
    %405 = arith.index_cast %401 : i32 to index
    %c0_102 = arith.constant 0 : index
    %406 = vector.load %arg7[%405, %c0_102] : memref<64x192xf32, #tpu.memory_space<vmem>>, vector<8x192xf32>
    %407 = vector.extract_strided_slice %406 {offsets = [0, 96], sizes = [8, 96], strides = [1, 1]} : vector<8x192xf32> to vector<8x96xf32>
    %cst_103 = arith.constant dense<0.000000e+00> : vector<8x96xf32>
    %408 = tpu.matmul %360, %7, %cst_103 {dimension_numbers = #tpu.dot_dimension_numbers<[1], [0], [0], [1], [0, 0, 1, 1], [], []>} : vector<8x32xf32>, vector<32x96xf32>, vector<8x96xf32> -> vector<8x96xf32>
    %cst_104 = arith.constant dense<0.000000e+00> : vector<8x96xf32>
    %409 = tpu.matmul %388, %8, %cst_104 {dimension_numbers = #tpu.dot_dimension_numbers<[1], [0], [0], [1], [0, 0, 1, 1], [], []>} : vector<8x32xf32>, vector<32x96xf32>, vector<8x96xf32> -> vector<8x96xf32>
    %410 = vector.extract_strided_slice %404 {offsets = [0, 0], sizes = [8, 32], strides = [1, 1]} : vector<8x96xf32> to vector<8x32xf32>
    %411 = vector.extract_strided_slice %408 {offsets = [0, 0], sizes = [8, 32], strides = [1, 1]} : vector<8x96xf32> to vector<8x32xf32>
    %412 = arith.addf %410, %411 : vector<8x32xf32>
    %413 = arith.negf %412 : vector<8x32xf32>
    %414 = math.exp %413 : vector<8x32xf32>
    %cst_105 = arith.constant 1.000000e+00 : f32
    %415 = vector.broadcast %cst_105 : f32 to vector<8x32xf32>
    %416 = arith.addf %415, %414 : vector<8x32xf32>
    %417 = arith.divf %415, %416 : vector<8x32xf32>
    %418 = vector.extract_strided_slice %404 {offsets = [0, 32], sizes = [8, 32], strides = [1, 1]} : vector<8x96xf32> to vector<8x32xf32>
    %419 = vector.extract_strided_slice %408 {offsets = [0, 32], sizes = [8, 32], strides = [1, 1]} : vector<8x96xf32> to vector<8x32xf32>
    %420 = arith.addf %418, %419 : vector<8x32xf32>
    %421 = arith.negf %420 : vector<8x32xf32>
    %422 = math.exp %421 : vector<8x32xf32>
    %cst_106 = arith.constant 1.000000e+00 : f32
    %423 = vector.broadcast %cst_106 : f32 to vector<8x32xf32>
    %424 = arith.addf %423, %422 : vector<8x32xf32>
    %425 = arith.divf %423, %424 : vector<8x32xf32>
    %426 = vector.extract_strided_slice %404 {offsets = [0, 64], sizes = [8, 32], strides = [1, 1]} : vector<8x96xf32> to vector<8x32xf32>
    %427 = vector.extract_strided_slice %408 {offsets = [0, 64], sizes = [8, 32], strides = [1, 1]} : vector<8x96xf32> to vector<8x32xf32>
    %428 = vector.broadcast %9 : vector<1x32xf32> to vector<8x32xf32>
    %429 = arith.addf %427, %428 : vector<8x32xf32>
    %430 = arith.mulf %417, %429 : vector<8x32xf32>
    %431 = arith.addf %426, %430 : vector<8x32xf32>
    %432 = math.tanh %431 : vector<8x32xf32>
    %cst_107 = arith.constant 1.000000e+00 : f32
    %433 = vector.broadcast %cst_107 : f32 to vector<8x32xf32>
    %434 = arith.subf %433, %425 : vector<8x32xf32>
    %435 = arith.mulf %434, %432 : vector<8x32xf32>
    %436 = arith.mulf %425, %360 : vector<8x32xf32>
    %437 = arith.addf %435, %436 : vector<8x32xf32>
    %438 = vector.extract_strided_slice %407 {offsets = [0, 0], sizes = [8, 32], strides = [1, 1]} : vector<8x96xf32> to vector<8x32xf32>
    %439 = vector.extract_strided_slice %409 {offsets = [0, 0], sizes = [8, 32], strides = [1, 1]} : vector<8x96xf32> to vector<8x32xf32>
    %440 = arith.addf %438, %439 : vector<8x32xf32>
    %441 = arith.negf %440 : vector<8x32xf32>
    %442 = math.exp %441 : vector<8x32xf32>
    %cst_108 = arith.constant 1.000000e+00 : f32
    %443 = vector.broadcast %cst_108 : f32 to vector<8x32xf32>
    %444 = arith.addf %443, %442 : vector<8x32xf32>
    %445 = arith.divf %443, %444 : vector<8x32xf32>
    %446 = vector.extract_strided_slice %407 {offsets = [0, 32], sizes = [8, 32], strides = [1, 1]} : vector<8x96xf32> to vector<8x32xf32>
    %447 = vector.extract_strided_slice %409 {offsets = [0, 32], sizes = [8, 32], strides = [1, 1]} : vector<8x96xf32> to vector<8x32xf32>
    %448 = arith.addf %446, %447 : vector<8x32xf32>
    %449 = arith.negf %448 : vector<8x32xf32>
    %450 = math.exp %449 : vector<8x32xf32>
    %cst_109 = arith.constant 1.000000e+00 : f32
    %451 = vector.broadcast %cst_109 : f32 to vector<8x32xf32>
    %452 = arith.addf %451, %450 : vector<8x32xf32>
    %453 = arith.divf %451, %452 : vector<8x32xf32>
    %454 = vector.extract_strided_slice %407 {offsets = [0, 64], sizes = [8, 32], strides = [1, 1]} : vector<8x96xf32> to vector<8x32xf32>
    %455 = vector.extract_strided_slice %409 {offsets = [0, 64], sizes = [8, 32], strides = [1, 1]} : vector<8x96xf32> to vector<8x32xf32>
    %456 = vector.broadcast %10 : vector<1x32xf32> to vector<8x32xf32>
    %457 = arith.addf %455, %456 : vector<8x32xf32>
    %458 = arith.mulf %445, %457 : vector<8x32xf32>
    %459 = arith.addf %454, %458 : vector<8x32xf32>
    %460 = math.tanh %459 : vector<8x32xf32>
    %cst_110 = arith.constant 1.000000e+00 : f32
    %461 = vector.broadcast %cst_110 : f32 to vector<8x32xf32>
    %462 = arith.subf %461, %453 : vector<8x32xf32>
    %463 = arith.mulf %462, %460 : vector<8x32xf32>
    %464 = arith.mulf %453, %388 : vector<8x32xf32>
    %465 = arith.addf %463, %464 : vector<8x32xf32>
    %466 = arith.index_cast %c5_i32 : i32 to index
    %c0_111 = arith.constant 0 : index
    %c0_112 = arith.constant 0 : index
    %467 = vector.load %arg6[%466, %c0_111, %c0_112] : memref<8x8x64xf32, #tpu.memory_space<vmem>>, vector<1x8x32xf32>
    %468 = vector.shape_cast %467 : vector<1x8x32xf32> to vector<8x32xf32>
    %469 = vector.shape_cast %437 : vector<8x32xf32> to vector<1x8x32xf32>
    tpu.vector_store %arg6[%466, %c0_111, %c0_112], %469 {strides = array<i32>} : memref<8x8x64xf32, #tpu.memory_space<vmem>>, vector<1x8x32xf32>,
    %470 = arith.index_cast %397 : i32 to index
    %c0_113 = arith.constant 0 : index
    %c32_114 = arith.constant 32 : index
    %471 = vector.load %arg6[%470, %c0_113, %c32_114] : memref<8x8x64xf32, #tpu.memory_space<vmem>>, vector<1x8x32xf32>
    %472 = vector.shape_cast %471 : vector<1x8x32xf32> to vector<8x32xf32>
    %473 = vector.shape_cast %465 : vector<8x32xf32> to vector<1x8x32xf32>
    tpu.vector_store %arg6[%470, %c0_113, %c32_114], %473 {strides = array<i32>} : memref<8x8x64xf32, #tpu.memory_space<vmem>>, vector<1x8x32xf32>,
    %c6_i32 = arith.constant 6 : i32
    %c7_i32_115 = arith.constant 7 : i32
    %474 = arith.subi %c7_i32_115, %c6_i32 : i32
    %c8_i32_116 = arith.constant 8 : i32
    %475 = arith.muli %c6_i32, %c8_i32_116 : i32
    %476 = tpu.assume_multiple %475, 8 : i32
    %c8_i32_117 = arith.constant 8 : i32
    %477 = arith.muli %474, %c8_i32_117 : i32
    %478 = tpu.assume_multiple %477, 8 : i32
    %479 = arith.index_cast %476 : i32 to index
    %c0_118 = arith.constant 0 : index
    %480 = vector.load %arg7[%479, %c0_118] : memref<64x192xf32, #tpu.memory_space<vmem>>, vector<8x192xf32>
    %481 = vector.extract_strided_slice %480 {offsets = [0, 0], sizes = [8, 96], strides = [1, 1]} : vector<8x192xf32> to vector<8x96xf32>
    %482 = arith.index_cast %478 : i32 to index
    %c0_119 = arith.constant 0 : index
    %483 = vector.load %arg7[%482, %c0_119] : memref<64x192xf32, #tpu.memory_space<vmem>>, vector<8x192xf32>
    %484 = vector.extract_strided_slice %483 {offsets = [0, 96], sizes = [8, 96], strides = [1, 1]} : vector<8x192xf32> to vector<8x96xf32>
    %cst_120 = arith.constant dense<0.000000e+00> : vector<8x96xf32>
    %485 = tpu.matmul %437, %7, %cst_120 {dimension_numbers = #tpu.dot_dimension_numbers<[1], [0], [0], [1], [0, 0, 1, 1], [], []>} : vector<8x32xf32>, vector<32x96xf32>, vector<8x96xf32> -> vector<8x96xf32>
    %cst_121 = arith.constant dense<0.000000e+00> : vector<8x96xf32>
    %486 = tpu.matmul %465, %8, %cst_121 {dimension_numbers = #tpu.dot_dimension_numbers<[1], [0], [0], [1], [0, 0, 1, 1], [], []>} : vector<8x32xf32>, vector<32x96xf32>, vector<8x96xf32> -> vector<8x96xf32>
    %487 = vector.extract_strided_slice %481 {offsets = [0, 0], sizes = [8, 32], strides = [1, 1]} : vector<8x96xf32> to vector<8x32xf32>
    %488 = vector.extract_strided_slice %485 {offsets = [0, 0], sizes = [8, 32], strides = [1, 1]} : vector<8x96xf32> to vector<8x32xf32>
    %489 = arith.addf %487, %488 : vector<8x32xf32>
    %490 = arith.negf %489 : vector<8x32xf32>
    %491 = math.exp %490 : vector<8x32xf32>
    %cst_122 = arith.constant 1.000000e+00 : f32
    %492 = vector.broadcast %cst_122 : f32 to vector<8x32xf32>
    %493 = arith.addf %492, %491 : vector<8x32xf32>
    %494 = arith.divf %492, %493 : vector<8x32xf32>
    %495 = vector.extract_strided_slice %481 {offsets = [0, 32], sizes = [8, 32], strides = [1, 1]} : vector<8x96xf32> to vector<8x32xf32>
    %496 = vector.extract_strided_slice %485 {offsets = [0, 32], sizes = [8, 32], strides = [1, 1]} : vector<8x96xf32> to vector<8x32xf32>
    %497 = arith.addf %495, %496 : vector<8x32xf32>
    %498 = arith.negf %497 : vector<8x32xf32>
    %499 = math.exp %498 : vector<8x32xf32>
    %cst_123 = arith.constant 1.000000e+00 : f32
    %500 = vector.broadcast %cst_123 : f32 to vector<8x32xf32>
    %501 = arith.addf %500, %499 : vector<8x32xf32>
    %502 = arith.divf %500, %501 : vector<8x32xf32>
    %503 = vector.extract_strided_slice %481 {offsets = [0, 64], sizes = [8, 32], strides = [1, 1]} : vector<8x96xf32> to vector<8x32xf32>
    %504 = vector.extract_strided_slice %485 {offsets = [0, 64], sizes = [8, 32], strides = [1, 1]} : vector<8x96xf32> to vector<8x32xf32>
    %505 = vector.broadcast %9 : vector<1x32xf32> to vector<8x32xf32>
    %506 = arith.addf %504, %505 : vector<8x32xf32>
    %507 = arith.mulf %494, %506 : vector<8x32xf32>
    %508 = arith.addf %503, %507 : vector<8x32xf32>
    %509 = math.tanh %508 : vector<8x32xf32>
    %cst_124 = arith.constant 1.000000e+00 : f32
    %510 = vector.broadcast %cst_124 : f32 to vector<8x32xf32>
    %511 = arith.subf %510, %502 : vector<8x32xf32>
    %512 = arith.mulf %511, %509 : vector<8x32xf32>
    %513 = arith.mulf %502, %437 : vector<8x32xf32>
    %514 = arith.addf %512, %513 : vector<8x32xf32>
    %515 = vector.extract_strided_slice %484 {offsets = [0, 0], sizes = [8, 32], strides = [1, 1]} : vector<8x96xf32> to vector<8x32xf32>
    %516 = vector.extract_strided_slice %486 {offsets = [0, 0], sizes = [8, 32], strides = [1, 1]} : vector<8x96xf32> to vector<8x32xf32>
    %517 = arith.addf %515, %516 : vector<8x32xf32>
    %518 = arith.negf %517 : vector<8x32xf32>
    %519 = math.exp %518 : vector<8x32xf32>
    %cst_125 = arith.constant 1.000000e+00 : f32
    %520 = vector.broadcast %cst_125 : f32 to vector<8x32xf32>
    %521 = arith.addf %520, %519 : vector<8x32xf32>
    %522 = arith.divf %520, %521 : vector<8x32xf32>
    %523 = vector.extract_strided_slice %484 {offsets = [0, 32], sizes = [8, 32], strides = [1, 1]} : vector<8x96xf32> to vector<8x32xf32>
    %524 = vector.extract_strided_slice %486 {offsets = [0, 32], sizes = [8, 32], strides = [1, 1]} : vector<8x96xf32> to vector<8x32xf32>
    %525 = arith.addf %523, %524 : vector<8x32xf32>
    %526 = arith.negf %525 : vector<8x32xf32>
    %527 = math.exp %526 : vector<8x32xf32>
    %cst_126 = arith.constant 1.000000e+00 : f32
    %528 = vector.broadcast %cst_126 : f32 to vector<8x32xf32>
    %529 = arith.addf %528, %527 : vector<8x32xf32>
    %530 = arith.divf %528, %529 : vector<8x32xf32>
    %531 = vector.extract_strided_slice %484 {offsets = [0, 64], sizes = [8, 32], strides = [1, 1]} : vector<8x96xf32> to vector<8x32xf32>
    %532 = vector.extract_strided_slice %486 {offsets = [0, 64], sizes = [8, 32], strides = [1, 1]} : vector<8x96xf32> to vector<8x32xf32>
    %533 = vector.broadcast %10 : vector<1x32xf32> to vector<8x32xf32>
    %534 = arith.addf %532, %533 : vector<8x32xf32>
    %535 = arith.mulf %522, %534 : vector<8x32xf32>
    %536 = arith.addf %531, %535 : vector<8x32xf32>
    %537 = math.tanh %536 : vector<8x32xf32>
    %cst_127 = arith.constant 1.000000e+00 : f32
    %538 = vector.broadcast %cst_127 : f32 to vector<8x32xf32>
    %539 = arith.subf %538, %530 : vector<8x32xf32>
    %540 = arith.mulf %539, %537 : vector<8x32xf32>
    %541 = arith.mulf %530, %465 : vector<8x32xf32>
    %542 = arith.addf %540, %541 : vector<8x32xf32>
    %543 = arith.index_cast %c6_i32 : i32 to index
    %c0_128 = arith.constant 0 : index
    %c0_129 = arith.constant 0 : index
    %544 = vector.load %arg6[%543, %c0_128, %c0_129] : memref<8x8x64xf32, #tpu.memory_space<vmem>>, vector<1x8x32xf32>
    %545 = vector.shape_cast %544 : vector<1x8x32xf32> to vector<8x32xf32>
    %546 = vector.shape_cast %514 : vector<8x32xf32> to vector<1x8x32xf32>
    tpu.vector_store %arg6[%543, %c0_128, %c0_129], %546 {strides = array<i32>} : memref<8x8x64xf32, #tpu.memory_space<vmem>>, vector<1x8x32xf32>,
    %547 = arith.index_cast %474 : i32 to index
    %c0_130 = arith.constant 0 : index
    %c32_131 = arith.constant 32 : index
    %548 = vector.load %arg6[%547, %c0_130, %c32_131] : memref<8x8x64xf32, #tpu.memory_space<vmem>>, vector<1x8x32xf32>
    %549 = vector.shape_cast %548 : vector<1x8x32xf32> to vector<8x32xf32>
    %550 = vector.shape_cast %542 : vector<8x32xf32> to vector<1x8x32xf32>
    tpu.vector_store %arg6[%547, %c0_130, %c32_131], %550 {strides = array<i32>} : memref<8x8x64xf32, #tpu.memory_space<vmem>>, vector<1x8x32xf32>,
    %c7_i32_132 = arith.constant 7 : i32
    %c7_i32_133 = arith.constant 7 : i32
    %551 = arith.subi %c7_i32_133, %c7_i32_132 : i32
    %c8_i32_134 = arith.constant 8 : i32
    %552 = arith.muli %c7_i32_132, %c8_i32_134 : i32
    %553 = tpu.assume_multiple %552, 8 : i32
    %c8_i32_135 = arith.constant 8 : i32
    %554 = arith.muli %551, %c8_i32_135 : i32
    %555 = tpu.assume_multiple %554, 8 : i32
    %556 = arith.index_cast %553 : i32 to index
    %c0_136 = arith.constant 0 : index
    %557 = vector.load %arg7[%556, %c0_136] : memref<64x192xf32, #tpu.memory_space<vmem>>, vector<8x192xf32>
    %558 = vector.extract_strided_slice %557 {offsets = [0, 0], sizes = [8, 96], strides = [1, 1]} : vector<8x192xf32> to vector<8x96xf32>
    %559 = arith.index_cast %555 : i32 to index
    %c0_137 = arith.constant 0 : index
    %560 = vector.load %arg7[%559, %c0_137] : memref<64x192xf32, #tpu.memory_space<vmem>>, vector<8x192xf32>
    %561 = vector.extract_strided_slice %560 {offsets = [0, 96], sizes = [8, 96], strides = [1, 1]} : vector<8x192xf32> to vector<8x96xf32>
    %cst_138 = arith.constant dense<0.000000e+00> : vector<8x96xf32>
    %562 = tpu.matmul %514, %7, %cst_138 {dimension_numbers = #tpu.dot_dimension_numbers<[1], [0], [0], [1], [0, 0, 1, 1], [], []>} : vector<8x32xf32>, vector<32x96xf32>, vector<8x96xf32> -> vector<8x96xf32>
    %cst_139 = arith.constant dense<0.000000e+00> : vector<8x96xf32>
    %563 = tpu.matmul %542, %8, %cst_139 {dimension_numbers = #tpu.dot_dimension_numbers<[1], [0], [0], [1], [0, 0, 1, 1], [], []>} : vector<8x32xf32>, vector<32x96xf32>, vector<8x96xf32> -> vector<8x96xf32>
    %564 = vector.extract_strided_slice %558 {offsets = [0, 0], sizes = [8, 32], strides = [1, 1]} : vector<8x96xf32> to vector<8x32xf32>
    %565 = vector.extract_strided_slice %562 {offsets = [0, 0], sizes = [8, 32], strides = [1, 1]} : vector<8x96xf32> to vector<8x32xf32>
    %566 = arith.addf %564, %565 : vector<8x32xf32>
    %567 = arith.negf %566 : vector<8x32xf32>
    %568 = math.exp %567 : vector<8x32xf32>
    %cst_140 = arith.constant 1.000000e+00 : f32
    %569 = vector.broadcast %cst_140 : f32 to vector<8x32xf32>
    %570 = arith.addf %569, %568 : vector<8x32xf32>
    %571 = arith.divf %569, %570 : vector<8x32xf32>
    %572 = vector.extract_strided_slice %558 {offsets = [0, 32], sizes = [8, 32], strides = [1, 1]} : vector<8x96xf32> to vector<8x32xf32>
    %573 = vector.extract_strided_slice %562 {offsets = [0, 32], sizes = [8, 32], strides = [1, 1]} : vector<8x96xf32> to vector<8x32xf32>
    %574 = arith.addf %572, %573 : vector<8x32xf32>
    %575 = arith.negf %574 : vector<8x32xf32>
    %576 = math.exp %575 : vector<8x32xf32>
    %cst_141 = arith.constant 1.000000e+00 : f32
    %577 = vector.broadcast %cst_141 : f32 to vector<8x32xf32>
    %578 = arith.addf %577, %576 : vector<8x32xf32>
    %579 = arith.divf %577, %578 : vector<8x32xf32>
    %580 = vector.extract_strided_slice %558 {offsets = [0, 64], sizes = [8, 32], strides = [1, 1]} : vector<8x96xf32> to vector<8x32xf32>
    %581 = vector.extract_strided_slice %562 {offsets = [0, 64], sizes = [8, 32], strides = [1, 1]} : vector<8x96xf32> to vector<8x32xf32>
    %582 = vector.broadcast %9 : vector<1x32xf32> to vector<8x32xf32>
    %583 = arith.addf %581, %582 : vector<8x32xf32>
    %584 = arith.mulf %571, %583 : vector<8x32xf32>
    %585 = arith.addf %580, %584 : vector<8x32xf32>
    %586 = math.tanh %585 : vector<8x32xf32>
    %cst_142 = arith.constant 1.000000e+00 : f32
    %587 = vector.broadcast %cst_142 : f32 to vector<8x32xf32>
    %588 = arith.subf %587, %579 : vector<8x32xf32>
    %589 = arith.mulf %588, %586 : vector<8x32xf32>
    %590 = arith.mulf %579, %514 : vector<8x32xf32>
    %591 = arith.addf %589, %590 : vector<8x32xf32>
    %592 = vector.extract_strided_slice %561 {offsets = [0, 0], sizes = [8, 32], strides = [1, 1]} : vector<8x96xf32> to vector<8x32xf32>
    %593 = vector.extract_strided_slice %563 {offsets = [0, 0], sizes = [8, 32], strides = [1, 1]} : vector<8x96xf32> to vector<8x32xf32>
    %594 = arith.addf %592, %593 : vector<8x32xf32>
    %595 = arith.negf %594 : vector<8x32xf32>
    %596 = math.exp %595 : vector<8x32xf32>
    %cst_143 = arith.constant 1.000000e+00 : f32
    %597 = vector.broadcast %cst_143 : f32 to vector<8x32xf32>
    %598 = arith.addf %597, %596 : vector<8x32xf32>
    %599 = arith.divf %597, %598 : vector<8x32xf32>
    %600 = vector.extract_strided_slice %561 {offsets = [0, 32], sizes = [8, 32], strides = [1, 1]} : vector<8x96xf32> to vector<8x32xf32>
    %601 = vector.extract_strided_slice %563 {offsets = [0, 32], sizes = [8, 32], strides = [1, 1]} : vector<8x96xf32> to vector<8x32xf32>
    %602 = arith.addf %600, %601 : vector<8x32xf32>
    %603 = arith.negf %602 : vector<8x32xf32>
    %604 = math.exp %603 : vector<8x32xf32>
    %cst_144 = arith.constant 1.000000e+00 : f32
    %605 = vector.broadcast %cst_144 : f32 to vector<8x32xf32>
    %606 = arith.addf %605, %604 : vector<8x32xf32>
    %607 = arith.divf %605, %606 : vector<8x32xf32>
    %608 = vector.extract_strided_slice %561 {offsets = [0, 64], sizes = [8, 32], strides = [1, 1]} : vector<8x96xf32> to vector<8x32xf32>
    %609 = vector.extract_strided_slice %563 {offsets = [0, 64], sizes = [8, 32], strides = [1, 1]} : vector<8x96xf32> to vector<8x32xf32>
    %610 = vector.broadcast %10 : vector<1x32xf32> to vector<8x32xf32>
    %611 = arith.addf %609, %610 : vector<8x32xf32>
    %612 = arith.mulf %599, %611 : vector<8x32xf32>
    %613 = arith.addf %608, %612 : vector<8x32xf32>
    %614 = math.tanh %613 : vector<8x32xf32>
    %cst_145 = arith.constant 1.000000e+00 : f32
    %615 = vector.broadcast %cst_145 : f32 to vector<8x32xf32>
    %616 = arith.subf %615, %607 : vector<8x32xf32>
    %617 = arith.mulf %616, %614 : vector<8x32xf32>
    %618 = arith.mulf %607, %542 : vector<8x32xf32>
    %619 = arith.addf %617, %618 : vector<8x32xf32>
    %620 = arith.index_cast %c7_i32_132 : i32 to index
    %c0_146 = arith.constant 0 : index
    %c0_147 = arith.constant 0 : index
    %621 = vector.load %arg6[%620, %c0_146, %c0_147] : memref<8x8x64xf32, #tpu.memory_space<vmem>>, vector<1x8x32xf32>
    %622 = vector.shape_cast %621 : vector<1x8x32xf32> to vector<8x32xf32>
    %623 = vector.shape_cast %591 : vector<8x32xf32> to vector<1x8x32xf32>
    tpu.vector_store %arg6[%620, %c0_146, %c0_147], %623 {strides = array<i32>} : memref<8x8x64xf32, #tpu.memory_space<vmem>>, vector<1x8x32xf32>,
    %624 = arith.index_cast %551 : i32 to index
    %c0_148 = arith.constant 0 : index
    %c32_149 = arith.constant 32 : index
    %625 = vector.load %arg6[%624, %c0_148, %c32_149] : memref<8x8x64xf32, #tpu.memory_space<vmem>>, vector<1x8x32xf32>
    %626 = vector.shape_cast %625 : vector<1x8x32xf32> to vector<8x32xf32>
    %627 = vector.shape_cast %619 : vector<8x32xf32> to vector<1x8x32xf32>
    tpu.vector_store %arg6[%624, %c0_148, %c32_149], %627 {strides = array<i32>} : memref<8x8x64xf32, #tpu.memory_space<vmem>>, vector<1x8x32xf32>,
    %c8_i32_150 = arith.constant 8 : i32
    return
  }
}

</mosaic_0001>

<bundles_post_ra>
// kernel: encoder_forward.1
= control target key start
LH: loop header
LB: loop body
LE: loop exit
PB: predicated region body
PF: predicated region fallthrough
CT: control target
= control target key end

     0   :  { %v2593_v0 = vmov 0.0|0.0   ;;  %v2594_v4 = vmov 0.0   ;;  %vm2595_vm0 = vmmov 0   ;;  %vm47_vm1 = vcmask 130048   ;;  %s2596_s16 = smov 64   ;;  %s2597_s13 = smov 32   ;;  %s3136_s1 = inlined_call_operand.vmem [shape: f32[16,192], index: 1, kind: input, shape index: {}]   ;;  %s3137_s3 = inlined_call_operand.vmem [shape: f32[32,96], index: 3, kind: input, shape index: {}]   ;;  %s3138_s5 = inlined_call_operand.vmem [shape: f32[1,64], index: 5, kind: input, shape index: {}]   ;;  %s3139_s0 = inlined_call_operand.vmem [shape: f32[64,16], index: 0, kind: input, shape index: {}]   ;;  %s3140_s2 = inlined_call_operand.vmem [shape: f32[1,192], index: 2, kind: input, shape index: {}]   ;;  %s3141_s4 = inlined_call_operand.vmem [shape: f32[32,96], index: 4, kind: input, shape index: {}]   ;;  %s3142_s6 = inlined_call_operand.vmem [shape: f32[8,8,64], index: 6, kind: output, shape index: {}]  }
   0x1   :  { %2362 = vmatprep.subr.bf16.mxu1 %v2593_v0  ;;  %v32_v1 = vld [vmem:[%s3136_s1 + $0x8] sm:$0xff]  ;;  %v34_v2 = vld [vmem:[%s3136_s1 + $0x18] sm:$0xff]  ;;  %v202_v3 = vld [vmem:[%s3137_s3] sm:$0xff]  ;;  %136 = vmatprep.mubr.f32.mxu0 %v2594_v4  ;;  %v37_v16 = vlaneseq  ;;  %vm186_vm2 = vcmask 523264   ;;  %s2598_s14 = smov 96   ;;  %vm220_vm3 = vcmask 261120  }
   0x2   :  { %v2358_v5 = vpack.c.bf16 %v34_v2, %v32_v1  ;;  %v203_v6 = vld [vmem:[%s3137_s3 + $0x8] sm:$0xff]  ;;  %v31_v7 = vld [vmem:[%s3136_s1] sm:$0xff]  ;;  %v33_v8 = vld [vmem:[%s3136_s1 + $0x10] sm:$0xff]  ;;  %2190 = vmatprep.mubr.msk.f32.mxu1 %vm2595_vm0, %v2594_v4  ;;  %vm450_vm4 = vcmask 523520  }
   0x3   :  { %v2656_v9 = vpack.c.bf16 %v203_v6, %v202_v3  ;;  %v2360_v10 = vpack.c.bf16 %v33_v8, %v31_v7  ;;  %v204_v11 = vld [vmem:[%s3137_s3 + $0x10] sm:$0xff]  ;;  %v205_v12 = vld [vmem:[%s3137_s3 + $0x18] sm:$0xff]  ;;  %v2667_v13 = vld [vmem:[%s3138_s5] ss:$0 sm:$0xff]  ;;  %v38_v17 = vshrl.u32 %v37_v16, 7 }
   0x4   :  { %2359 = vmatprep.subr.bf16.mxu0 %v2358_v5  ;;  %v23_v14 = vld [vmem:[%s3139_s0] sm:$0xff]  ;;  %v2673_v15 = vpack.c.bf16 %v205_v12, %v204_v11  ;;  %376 = vrot.lane.b32.xlu0 %v2667_v13, %s2596_s16  ;;  %v24_v21 = vld [vmem:[%s3139_s0 + $0x8] sm:$0xff]  ;;  %v208_v25 = vld [vmem:[%s3141_s4 + $0x10] sm:$0xff] }
   0x5   :  { %2364 = vmatpush3.bf16.msra.mxu1 %v2656_v9  ;;  %2361 = vmatpush1.bf16.msra.mxu0 %v2360_v10  ;;  %v39_v18 = vsub.s32 0, %v38_v17  ;;  %v35_v19 = vld [vmem:[%s3140_s2] sm:$0x3]  ;;  %v43_v20 = vsub.s32 1, %v38_v17  ;;  %v207_v24 = vld [vmem:[%s3141_s4 + $0x8] sm:$0xff]  ;;  %v209_v28 = vld [vmem:[%s3141_s4 + $0x18] sm:$0xff] }
   0x6   :  { %2365 = vmatprep.subr.bf16.mxu1 %v2593_v0  ;;  %2386 = vmatprep.subr.bf16.mxu0 %v2593_v0  ;;  %v206_v23 = vld [vmem:[%s3141_s4] sm:$0xff]  ;;  %v25_v29 = vld [vmem:[%s3139_s0 + $0x10] sm:$0xff]  ;;  %v2720_v31 = vpack.c.bf16 %v209_v28, %v208_v25  ;;  %v26_v36 = vld [vmem:[%s3139_s0 + $0x18] sm:$0xff] }
   0x7   :  { %v2696_v22 = vrot.slane %v35_v19, %v39_v18  ;;  %v2708_v26 = vrot.slane %v35_v19, %v43_v20  ;;  %v2710_v27 = vpack.c.bf16 %v207_v24, %v206_v23  ;;  %v27_v40 = vld [vmem:[%s3139_s0 + $0x20] sm:$0xff]  ;;  %v28_v41 = vld [vmem:[%s3139_s0 + $0x28] sm:$0xff]  ;;  %v29_v42 = vld [vmem:[%s3139_s0 + $0x30] sm:$0xff] }
   0x8   :  { %2041 = vmatmul.mubr.msk.f32.vlgmr.msra.gmra.mrb[0].mxu0 %vm47_vm1, %v23_v14  ;;  %v30_v47 = vld [vmem:[%s3139_s0 + $0x38] sm:$0xff] }
   0x9   :  { %2367 = vmatpush3.bf16.msra.mxu1 %v2673_v15  ;;  %142 = vmatprep.mubr.f32.mxu0 %v2594_v4 }
   0xa   :  { %2368 = vmatprep.subr.bf16.mxu1 %v2593_v0  ;;  %2388 = vmatpush3.bf16.msra.mxu0 %v2656_v9 }
   0xb   :  { %2389 = vmatprep.subr.bf16.mxu0 %v2593_v0 }
   0xc   :  { %2191 = vmatmul.mubr.f32.vlgmr.msra.gmra.mrb[0].mxu1 %v2594_v4  ;;  %2042 = vmatmul.mubr.msk.f32.gmra.mrb[2].mxu0 %vm47_vm1, %v24_v21 }
   0xd   :  { %2201 = vmatprep.mubr.msk.f32.mxu1 %vm2595_vm0, %v2594_v4  ;;  %148 = vmatprep.mubr.f32.mxu0 %v2594_v4 }
   0xe   :  { %2391 = vmatpush3.bf16.msra.mxu0 %v2673_v15  ;;  %2370 = vmatpush3.bf16.msra.mxu1 %v2710_v27 }
   0xf   :  { %2398 = vmatprep.subr.bf16.mxu0 %v2593_v0  ;;  %2371 = vmatprep.subr.bf16.mxu1 %v2593_v0 }
  0x10   :  { %2043 = vmatmul.mubr.msk.f32.gmra.mrb[4].mxu0 %vm47_vm1, %v25_v29 }
  0x11   :  { %154 = vmatprep.mubr.f32.mxu0 %v2594_v4 }
  0x12   :  { %2373 = vmatpush3.bf16.msra.mxu1 %v2720_v31 }
  0x13   :  { %2374 = vmatprep.subr.bf16.mxu1 %v2593_v0 }
  0x14   :  { %2044 = vmatmul.mubr.msk.f32.gmra.mrb[6].mxu0 %vm47_vm1, %v26_v36 }
  0x15   :  { %160 = vmatprep.mubr.f32.mxu0 %v2594_v4  ;;  %2202 = vmatmul.mubr.f32.vlgmr.msra.gmra.mrb[2].mxu1 %v2594_v4 }
  0x16   :  { %2376 = vmatpush3.bf16.msra.mxu1 %v2656_v9  ;;  %2212 = vmatprep.mubr.msk.f32.mxu1 %vm2595_vm0, %v2594_v4 }
  0x17   :  { %2377 = vmatprep.subr.bf16.mxu1 %v2593_v0 }
  0x18   :  { %2045 = vmatmul.mubr.msk.f32.gmra.mrb[8].mxu0 %vm47_vm1, %v27_v40 }
  0x19   :  { %166 = vmatprep.mubr.f32.mxu0 %v2594_v4 }
  0x1a   :  { %2379 = vmatpush3.bf16.msra.mxu1 %v2673_v15 }
  0x1b   :  { %2380 = vmatprep.subr.bf16.mxu1 %v2593_v0 }
  0x1c   :  { %2046 = vmatmul.mubr.msk.f32.gmra.mrb[10].mxu0 %vm47_vm1, %v28_v41 }
  0x1d   :  { %172 = vmatprep.mubr.f32.mxu0 %v2594_v4 }
  0x20   :  { %2047 = vmatmul.mubr.msk.f32.gmra.mrb[12].mxu0 %vm47_vm1, %v29_v42 }
  0x21   :  { %178 = vmatprep.mubr.f32.mxu0 %v2594_v4 }
  0x24   :  { %2048 = vmatmul.mubr.msk.f32.gmra.mrb[14].mxu0 %vm47_vm1, %v30_v47 }
  0x25   :  { %2234 = vmatprep.mubr.msk.f32.mxu0 %vm2595_vm0, %v2594_v4 }
  0x76   :  { %v2725_v34 = vpop.permute.xlu0 %376 }
  0xdb   :  { %v138_v30 = vpop.f32.mrb[0].mxu0 }
  0xdc   :  { %v139_v32 = vadd.f32 %v138_v30, %v2696_v22  ;;  %v140_v33 = vpop.f32.mrb[1].mxu0 }
  0xdd   :  { %v141_v35 = vadd.f32 %v140_v33, %v2708_v26 }
  0xde   :  { %185 = vst [vmem:[#allocation2] sm:$0xff] %v139_v32 }
  0xdf   :  { %v290_v37 = vpop.f32.mrb[0].mxu1  ;;  %187 = vst.msk [vmem:[#allocation2 + $0x8] sm:$0xff] %vm186_vm2, %v141_v35  ;;  %v144_v55 = vpop.f32.mrb[2].mxu0 }
  0xe0   :  { %v379_v38 = vadd.f32 %v2725_v34, %v290_v37  ;;  %v2192_v39 = vpop.f32.mrb[1].mxu1  ;;  %v364_v43 = vadd.f32 %v290_v37, %v139_v32  ;;  %v2772_v56 = vadd.f32 %v144_v55, %v2696_v22  ;;  %v146_v57 = vpop.f32.mrb[3].mxu0 }
  0xe1   :  { %v147_v58 = vadd.f32 %v146_v57, %v2708_v26 }
  0xe2   :  { %381 = vrot.lane.b32.xlu0 %v379_v38, %s2596_s16  ;;  %v2049_v44 = vmul.f32 -1.442695, %v364_v43 }
  0xe3   :  { %v150_v59 = vpop.f32.mrb[4].mxu0  ;;  %189 = vst.msk [vmem:[#allocation2 + $0x18] sm:$0xff] %vm186_vm2, %v147_v58 }
  0xe4   :  { %2464 = vpow2.f32 %v2049_v44  ;;  %v2776_v60 = vadd.f32 %v150_v59, %v2696_v22  ;;  %v152_v61 = vpop.f32.mrb[5].mxu0 }
  0xe5   :  { %v153_v63 = vadd.f32 %v152_v61, %v2708_v26 }
  0xe6   :  { %417 = vrot.lane.b32.xlu0 %v2667_v13, %s2597_s13 }
  0xe7   :  { %v156_v1 = vpop.f32.mrb[6].mxu0  ;;  %191 = vst.msk [vmem:[#allocation2 + $0x28] sm:$0xff] %vm186_vm2, %v153_v63 }
  0xe8   :  { %v360_v51 = vpop.f32.mrb[2].mxu1  ;;  %v2782_v2 = vadd.f32 %v156_v1, %v2696_v22  ;;  %v158_v3 = vpop.f32.mrb[7].mxu0 }
  0xe9   :  { %v2203_v52 = vpop.f32.mrb[3].mxu1  ;;  %v159_v5 = vadd.f32 %v158_v3, %v2708_v26 }
  0xea   :  { %400 = vrot.lane.b32.xlu0 %v360_v51, %s2598_s14 }
  0xeb   :  { %v162_v6 = vpop.f32.mrb[8].mxu0  ;;  %193 = vst.msk [vmem:[#allocation2 + $0x38] sm:$0xff] %vm186_vm2, %v159_v5 }
  0xec   :  { %v2787_v7 = vadd.f32 %v162_v6, %v2696_v22  ;;  %v164_v8 = vpop.f32.mrb[9].mxu0 }
  0xed   :  { %v165_v10 = vadd.f32 %v164_v8, %v2708_v26 }
  0xee   :  { %v2465_v45 = vpop.eup %2464 }
  0xef   :  { %v368_v46 = vadd.f32 1.0, %v2465_v45  ;;  %v168_v11 = vpop.f32.mrb[10].mxu0  ;;  %195 = vst.msk [vmem:[#allocation2 + $0x48] sm:$0xff] %vm186_vm2, %v165_v10 }
  0xf0   :  { %v2792_v12 = vadd.f32 %v168_v11, %v2696_v22  ;;  %v170_v13 = vpop.f32.mrb[11].mxu0 }
  0xf1   :  { %2466 = vrcp.f32 %v368_v46  ;;  %v171_v14 = vadd.f32 %v170_v13, %v2708_v26 }
  0xf3   :  { %v174_v16 = vpop.f32.mrb[12].mxu0  ;;  %197 = vst.msk [vmem:[#allocation2 + $0x58] sm:$0xff] %vm186_vm2, %v171_v14 }
  0xf4   :  { %v2797_v17 = vadd.f32 %v174_v16, %v2696_v22  ;;  %v176_v18 = vpop.f32.mrb[13].mxu0 }
  0xf5   :  { %v177_v19 = vadd.f32 %v176_v18, %v2708_v26 }
  0xf7   :  { %199 = vst.msk [vmem:[#allocation2 + $0x68] sm:$0xff] %vm186_vm2, %v177_v19  ;;  %v180_v20 = vpop.f32.mrb[14].mxu0 }
  0xf8   :  { %v2803_v21 = vadd.f32 %v180_v20, %v2696_v22  ;;  %v182_v23 = vpop.f32.mrb[15].mxu0 }
  0xf9   :  { %v183_v25 = vadd.f32 %v182_v23, %v2708_v26 }
  0xfa   :  { %200 = vst [vmem:[#allocation2 + $0x70] sm:$0xff] %v2803_v21 }
  0xfb   :  { %v2467_v48 = vpop.eup %2466  ;;  %201 = vst.msk [vmem:[#allocation2 + $0x78] sm:$0xff] %vm186_vm2, %v183_v25 }
  0xfc   :  { %v391_v24 = vsub.f32 1.0, %v2467_v48  ;;  %v397_v29 = vmul.f32 0.0, %v2467_v48 }
 0x102   :  { %v219_v43 = vld [vmem:[#allocation2 + $0x78] sm:$0xff] }
 0x154   :  { %v382_v49 = vpop.permute.xlu0 %381 }
 0x155   :  { %v384_v50 = vmul.f32 %v2467_v48, %v382_v49 }
 0x157   :  { %386 = vrot.lane.b32.xlu1 %v384_v50, %s2596_s16 }
 0x1c9   :  { %v387_v53 = vpop.permute.xlu1 %386 }
 0x1ca   :  { %v389_v54 = vadd.f32 %v387_v53, %v139_v32  ;;  %v2808_v32 = vpop.permute.xlu0 %417 }
 0x1cb   :  { %v420_v22 = vadd.f32 %v2808_v32, %v360_v51 }
 0x1cc   :  { %2468 = vtanh.f32 %v389_v54 }
 0x1ce   :  { %v401_v35 = vpop.permute.xlu0 %400 }
 0x1cf   :  { %v403_v36 = vadd.f32 %v401_v35, %v2803_v21  ;;  %v410_v47 = vadd.f32 %v401_v35, %v219_v43 }
 0x1d1   :  { %v2051_v26 = vmul.f32 -1.442695, %v403_v36  ;;  %v2052_v51 = vmul.f32 -1.442695, %v410_v47 }
 0x1d3   :  { %2470 = vpow2.f32 %v2051_v26 }
 0x1d6   :  { %v2469_v62 = vpop.eup %2468 }
 0x1d7   :  { %393 = vrot.lane.b32.xlu1 %v2469_v62, %s2598_s14 }
 0x1dd   :  { %v2471_v37 = vpop.eup %2470 }
 0x1de   :  { %v407_v38 = vadd.f32 1.0, %v2471_v37 }
 0x1e0   :  { %2472 = vrcp.f32 %v407_v38  ;;  %v460_v38 = vld [vmem:[#allocation2 + $0x68] sm:$0xff] }
 0x1ea   :  { %v2473_v40 = vpop.eup %2472 }
 0x249   :  { %v394_v28 = vpop.permute.xlu1 %393 }
 0x24a   :  { %v396_v30 = vmul.f32 %v394_v28, %v391_v24 }
 0x24c   :  { %v2810_v33 = vadd.f32 %v397_v29, %v396_v30 }
 0x24e   :  { %441 = vrot.lane.b32.xlu1 %v2810_v33, %s2598_s14 }
 0x252   :  { %422 = vrot.lane.b32.xlu1 %v420_v22, %s2597_s13 }
 0x2c0   :  { %v442_v39 = vpop.permute.xlu1 %441 }
 0x2c1   :  { %444 = vst.msk [vmem:[%s3142_s6] sm:$0xff] %vm220_vm3, %v442_v39  ;;  %2213 = vmatmul.mubr.msk.f32.vlgmr.msra.gmra.mrb[4].mxu1 %vm220_vm3, %v442_v39 }
 0x2c2   :  { %2382 = vmatpush3.bf16.msra.mxu1 %v2710_v27  ;;  %2223 = vmatprep.mubr.msk.f32.mxu1 %vm2595_vm0, %v2594_v4 }
 0x2c3   :  { %2383 = vmatprep.subr.bf16.mxu1 %v2593_v0 }
 0x2c4   :  { %v423_v41 = vpop.permute.xlu1 %422 }
 0x2c5   :  { %v425_v42 = vmul.f32 %v2473_v40, %v423_v41 }
 0x2c6   :  { %2385 = vmatpush3.bf16.msra.mxu1 %v2720_v31 }
 0x2c7   :  { %427 = vrot.lane.b32.xlu0 %v425_v42, %s2596_s16  ;;  %2392 = vmatprep.subr.bf16.mxu1 %v2593_v0 }
 0x339   :  { %v428_v44 = vpop.permute.xlu0 %427 }
 0x33a   :  { %v430_v45 = vadd.f32 %v428_v44, %v219_v43 }
 0x33c   :  { %2474 = vtanh.f32 %v430_v45 }
 0x33d   :  { %2476 = vpow2.f32 %v2052_v51 }
 0x346   :  { %v2475_v46 = vpop.eup %2474 }
 0x347   :  { %434 = vrot.lane.b32.xlu1 %v2475_v46, %s2598_s14  ;;  %v2477_v52 = vpop.eup %2476 }
 0x348   :  { %v414_v53 = vadd.f32 1.0, %v2477_v52 }
 0x34a   :  { %2478 = vrcp.f32 %v414_v53 }
 0x354   :  { %v2479_v54 = vpop.eup %2478 }
 0x355   :  { %v432_v55 = vsub.f32 1.0, %v2479_v54  ;;  %v438_v58 = vmul.f32 0.0, %v2479_v54 }
 0x394   :  { %v529_v48 = vpop.f32.mrb[4].mxu1 }
 0x395   :  { %v612_v49 = vadd.f32 %v529_v48, %v2725_v34  ;;  %v2214_v50 = vpop.f32.mrb[5].mxu1  ;;  %v605_v62 = vadd.f32 %v529_v48, %v2772_v56 }
 0x397   :  { %614 = vrot.lane.b32.xlu0 %v612_v49, %s2596_s16  ;;  %v2056_v63 = vmul.f32 -1.442695, %v605_v62 }
 0x399   :  { %2480 = vpow2.f32 %v2056_v63 }
 0x3a3   :  { %v2481_v1 = vpop.eup %2480 }
 0x3a4   :  { %v609_v3 = vadd.f32 1.0, %v2481_v1 }
 0x3a6   :  { %2482 = vrcp.f32 %v609_v3 }
 0x3b0   :  { %v2483_v5 = vpop.eup %2482 }
 0x3b1   :  { %v624_v19 = vsub.f32 1.0, %v2483_v5  ;;  %v630_v23 = vmul.f32 %v2483_v5, %v2810_v33 }
 0x3b9   :  { %v435_v57 = vpop.permute.xlu1 %434 }
 0x3ba   :  { %v437_v59 = vmul.f32 %v435_v57, %v432_v55 }
 0x3bc   :  { %v2832_v61 = vadd.f32 %v438_v58, %v437_v59 }
 0x3be   :  { %2224 = vmatmul.mubr.msk.f32.vlgmr.msra.gmra.mrb[6].mxu1 %vm220_vm3, %v2832_v61 }
 0x3bf   :  { %2394 = vmatpush3.bf16.msra.mxu1 %v2710_v27  ;;  %2245 = vmatprep.mubr.msk.f32.mxu1 %vm2595_vm0, %v2594_v4 }
 0x3c0   :  { %2395 = vmatprep.subr.bf16.mxu1 %v2593_v0 }
 0x3c3   :  { %2397 = vmatpush3.bf16.msra.mxu1 %v2720_v31 }
 0x3c4   :  { %2404 = vmatprep.subr.bf16.mxu1 %v2593_v0 }
 0x409   :  { %v615_v6 = vpop.permute.xlu0 %614 }
 0x40a   :  { %v617_v8 = vmul.f32 %v2483_v5, %v615_v6 }
 0x40c   :  { %619 = vrot.lane.b32.xlu1 %v617_v8, %s2596_s16 }
 0x47e   :  { %v620_v10 = vpop.permute.xlu1 %619 }
 0x47f   :  { %v622_v11 = vadd.f32 %v620_v10, %v2772_v56 }
 0x481   :  { %2484 = vtanh.f32 %v622_v11 }
 0x48b   :  { %v2485_v13 = vpop.eup %2484 }
 0x48c   :  { %626 = vrot.lane.b32.xlu0 %v2485_v13, %s2598_s14 }
 0x491   :  { %v601_v14 = vpop.f32.mrb[6].mxu1 }
 0x492   :  { %v650_v16 = vadd.f32 %v601_v14, %v2808_v32  ;;  %v2225_v18 = vpop.f32.mrb[7].mxu1  ;;  %633 = vrot.lane.b32.xlu1 %v601_v14, %s2598_s14 }
 0x494   :  { %652 = vrot.lane.b32.xlu0 %v650_v16, %s2597_s13 }
 0x4fe   :  { %v627_v20 = vpop.permute.xlu0 %626 }
 0x4ff   :  { %v629_v24 = vmul.f32 %v627_v20, %v624_v19 }
 0x501   :  { %v2850_v25 = vadd.f32 %v630_v23, %v629_v24 }
 0x503   :  { %671 = vrot.lane.b32.xlu1 %v2850_v25, %s2598_s14 }
 0x504   :  { %v634_v28 = vpop.permute.xlu1 %633 }
 0x505   :  { %v636_v29 = vadd.f32 %v634_v28, %v2797_v17  ;;  %v643_v42 = vadd.f32 %v634_v28, %v460_v38 }
 0x506   :  { %v653_v26 = vpop.permute.xlu0 %652 }
 0x507   :  { %v2057_v30 = vmul.f32 -1.442695, %v636_v29  ;;  %v2058_v43 = vmul.f32 -1.442695, %v643_v42 }
 0x509   :  { %2486 = vpow2.f32 %v2057_v30 }
 0x513   :  { %v2487_v22 = vpop.eup %2486 }
 0x514   :  { %v640_v35 = vadd.f32 1.0, %v2487_v22 }
 0x516   :  { %2488 = vrcp.f32 %v640_v35 }
 0x520   :  { %v2489_v36 = vpop.eup %2488 }
 0x521   :  { %v655_v37 = vmul.f32 %v2489_v36, %v653_v26 }
 0x523   :  { %657 = vrot.lane.b32.xlu0 %v655_v37, %s2596_s16 }
 0x575   :  { %v672_v33 = vpop.permute.xlu1 %671 }
 0x576   :  { %2059 = vst.msk [vmem:[%s3142_s6 + $0x8] sm:$0xff] %vm220_vm3, %v672_v33  ;;  %2235 = vmatmul.mubr.msk.f32.vlgmr.msra.gmra.mrb[16].mxu0 %vm220_vm3, %v672_v33 }
 0x577   :  { %2400 = vmatpush3.bf16.msra.mxu0 %v2656_v9  ;;  %2256 = vmatprep.mubr.msk.f32.mxu0 %vm2595_vm0, %v2594_v4 }
 0x578   :  { %2401 = vmatprep.subr.bf16.mxu0 %v2593_v0 }
 0x57b   :  { %2403 = vmatpush3.bf16.msra.mxu0 %v2673_v15 }
 0x57c   :  { %2410 = vmatprep.subr.bf16.mxu0 %v2593_v0 }
 0x595   :  { %v658_v39 = vpop.permute.xlu0 %657 }
 0x596   :  { %v660_v40 = vadd.f32 %v658_v39, %v460_v38 }
 0x598   :  { %2490 = vtanh.f32 %v660_v40 }
 0x599   :  { %2492 = vpow2.f32 %v2058_v43 }
 0x5a2   :  { %v2491_v41 = vpop.eup %2490 }
 0x5a3   :  { %664 = vrot.lane.b32.xlu1 %v2491_v41, %s2598_s14  ;;  %v2493_v44 = vpop.eup %2492 }
 0x5a4   :  { %v647_v45 = vadd.f32 1.0, %v2493_v44 }
 0x5a6   :  { %2494 = vrcp.f32 %v647_v45 }
 0x5b0   :  { %v2495_v46 = vpop.eup %2494 }
 0x5b1   :  { %v662_v47 = vsub.f32 1.0, %v2495_v46  ;;  %v668_v49 = vmul.f32 %v2495_v46, %v2832_v61 }
 0x615   :  { %v665_v48 = vpop.permute.xlu1 %664 }
 0x616   :  { %v667_v50 = vmul.f32 %v665_v48, %v662_v47 }
 0x618   :  { %v2869_v51 = vadd.f32 %v668_v49, %v667_v50 }
 0x61a   :  { %2246 = vmatmul.mubr.msk.f32.vlgmr.msra.gmra.mrb[8].mxu1 %vm220_vm3, %v2869_v51 }
 0x61b   :  { %2406 = vmatpush3.bf16.msra.mxu1 %v2710_v27  ;;  %2267 = vmatprep.mubr.msk.f32.mxu1 %vm2595_vm0, %v2594_v4 }
 0x61c   :  { %2407 = vmatprep.subr.bf16.mxu1 %v2593_v0 }
 0x61f   :  { %2409 = vmatpush3.bf16.msra.mxu1 %v2720_v31 }
 0x620   :  { %2416 = vmatprep.subr.bf16.mxu1 %v2593_v0 }
 0x649   :  { %v759_v52 = vpop.f32.mrb[16].mxu0 }
 0x64a   :  { %v842_v53 = vadd.f32 %v759_v52, %v2725_v34  ;;  %v2236_v54 = vpop.f32.mrb[17].mxu0  ;;  %v835_v55 = vadd.f32 %v759_v52, %v2776_v60 }
 0x64c   :  { %844 = vrot.lane.b32.xlu0 %v842_v53, %s2596_s16  ;;  %v2063_v57 = vmul.f32 -1.442695, %v835_v55 }
 0x64e   :  { %2496 = vpow2.f32 %v2063_v57 }
 0x658   :  { %v2497_v58 = vpop.eup %2496 }
 0x659   :  { %v839_v59 = vadd.f32 1.0, %v2497_v58 }
 0x65b   :  { %2498 = vrcp.f32 %v839_v59 }
 0x665   :  { %v2499_v62 = vpop.eup %2498 }
 0x666   :  { %v854_v20 = vsub.f32 1.0, %v2499_v62  ;;  %v860_v24 = vmul.f32 %v2499_v62, %v2850_v25  ;;  %v690_v25 = vld [vmem:[#allocation2 + $0x58] sm:$0xff] }
 0x6be   :  { %v845_v63 = vpop.permute.xlu0 %844 }
 0x6bf   :  { %v847_v1 = vmul.f32 %v2499_v62, %v845_v63 }
 0x6c1   :  { %849 = vrot.lane.b32.xlu1 %v847_v1, %s2596_s16 }
 0x6ed   :  { %v831_v3 = vpop.f32.mrb[8].mxu1 }
 0x6ee   :  { %863 = vrot.lane.b32.xlu1 %v831_v3, %s2598_s14  ;;  %v2247_v5 = vpop.f32.mrb[9].mxu1  ;;  %v880_v11 = vadd.f32 %v831_v3, %v2808_v32 }
 0x733   :  { %v850_v6 = vpop.permute.xlu1 %849 }
 0x734   :  { %v852_v8 = vadd.f32 %v850_v6, %v2776_v60 }
 0x736   :  { %2500 = vtanh.f32 %v852_v8 }
 0x740   :  { %v2501_v10 = vpop.eup %2500 }
 0x741   :  { %856 = vrot.lane.b32.xlu0 %v2501_v10, %s2598_s14 }
 0x745   :  { %882 = vrot.lane.b32.xlu0 %v880_v11, %s2597_s13 }
 0x760   :  { %v864_v13 = vpop.permute.xlu1 %863 }
 0x761   :  { %v866_v14 = vadd.f32 %v864_v13, %v2792_v12  ;;  %v873_v38 = vadd.f32 %v864_v13, %v690_v25 }
 0x763   :  { %v2064_v16 = vmul.f32 -1.442695, %v866_v14  ;;  %v2065_v39 = vmul.f32 -1.442695, %v873_v38 }
 0x765   :  { %2502 = vpow2.f32 %v2064_v16 }
 0x76f   :  { %v2503_v18 = vpop.eup %2502 }
 0x770   :  { %v870_v19 = vadd.f32 1.0, %v2503_v18 }
 0x772   :  { %2504 = vrcp.f32 %v870_v19 }
 0x77c   :  { %v2505_v30 = vpop.eup %2504 }
 0x7b3   :  { %v857_v23 = vpop.permute.xlu0 %856 }
 0x7b4   :  { %v859_v28 = vmul.f32 %v857_v23, %v854_v20 }
 0x7b6   :  { %v2890_v29 = vadd.f32 %v860_v24, %v859_v28 }
 0x7b7   :  { %v883_v22 = vpop.permute.xlu0 %882 }
 0x7b8   :  { %v885_v35 = vmul.f32 %v2505_v30, %v883_v22  ;;  %901 = vrot.lane.b32.xlu1 %v2890_v29, %s2598_s14  ;;  %v920_v22 = vld [vmem:[#allocation2 + $0x48] sm:$0xff] }
 0x7ba   :  { %887 = vrot.lane.b32.xlu0 %v885_v35, %s2596_s16 }
 0x82a   :  { %v902_v36 = vpop.permute.xlu1 %901 }
 0x82b   :  { %2066 = vst.msk [vmem:[%s3142_s6 + $0x10] sm:$0xff] %vm220_vm3, %v902_v36  ;;  %2257 = vmatmul.mubr.msk.f32.vlgmr.msra.gmra.mrb[18].mxu0 %vm220_vm3, %v902_v36 }
 0x82c   :  { %v888_v26 = vpop.permute.xlu0 %887  ;;  %2412 = vmatpush3.bf16.msra.mxu0 %v2656_v9  ;;  %2278 = vmatprep.mubr.msk.f32.mxu0 %vm2595_vm0, %v2594_v4 }
 0x82d   :  { %v890_v37 = vadd.f32 %v888_v26, %v690_v25  ;;  %2413 = vmatprep.subr.bf16.mxu0 %v2593_v0 }
 0x82f   :  { %2506 = vtanh.f32 %v890_v37 }
 0x830   :  { %2415 = vmatpush3.bf16.msra.mxu0 %v2673_v15  ;;  %2508 = vpow2.f32 %v2065_v39 }
 0x831   :  { %2422 = vmatprep.subr.bf16.mxu0 %v2593_v0 }
 0x839   :  { %v2507_v33 = vpop.eup %2506 }
 0x83a   :  { %894 = vrot.lane.b32.xlu1 %v2507_v33, %s2598_s14  ;;  %v2509_v40 = vpop.eup %2508 }
 0x83b   :  { %v877_v41 = vadd.f32 1.0, %v2509_v40 }
 0x83d   :  { %2510 = vrcp.f32 %v877_v41 }
 0x847   :  { %v2511_v42 = vpop.eup %2510 }
 0x848   :  { %v892_v43 = vsub.f32 1.0, %v2511_v42  ;;  %v898_v45 = vmul.f32 %v2511_v42, %v2869_v51 }
 0x8ac   :  { %v895_v44 = vpop.permute.xlu1 %894 }
 0x8ad   :  { %v897_v46 = vmul.f32 %v895_v44, %v892_v43 }
 0x8af   :  { %v2908_v47 = vadd.f32 %v898_v45, %v897_v46 }
 0x8b1   :  { %2268 = vmatmul.mubr.msk.f32.vlgmr.msra.gmra.mrb[10].mxu1 %vm220_vm3, %v2908_v47 }
 0x8b2   :  { %2418 = vmatpush3.bf16.msra.mxu1 %v2710_v27  ;;  %2289 = vmatprep.mubr.msk.f32.mxu1 %vm2595_vm0, %v2594_v4 }
 0x8b3   :  { %2419 = vmatprep.subr.bf16.mxu1 %v2593_v0 }
 0x8b6   :  { %2421 = vmatpush3.bf16.msra.mxu1 %v2720_v31 }
 0x8b7   :  { %2428 = vmatprep.subr.bf16.mxu1 %v2593_v0 }
 0x8fe   :  { %v989_v48 = vpop.f32.mrb[18].mxu0 }
 0x8ff   :  { %v1072_v49 = vadd.f32 %v989_v48, %v2725_v34  ;;  %v2258_v50 = vpop.f32.mrb[19].mxu0  ;;  %v1065_v52 = vadd.f32 %v989_v48, %v2782_v2 }
 0x901   :  { %1074 = vrot.lane.b32.xlu0 %v1072_v49, %s2596_s16  ;;  %v2070_v53 = vmul.f32 -1.442695, %v1065_v52 }
 0x903   :  { %2512 = vpow2.f32 %v2070_v53 }
 0x90d   :  { %v2513_v54 = vpop.eup %2512 }
 0x90e   :  { %v1069_v55 = vadd.f32 1.0, %v2513_v54 }
 0x910   :  { %2514 = vrcp.f32 %v1069_v55 }
 0x91a   :  { %v2515_v57 = vpop.eup %2514 }
 0x91b   :  { %v1084_v20 = vsub.f32 1.0, %v2515_v57  ;;  %v1090_v24 = vmul.f32 %v2515_v57, %v2890_v29 }
 0x973   :  { %v1075_v58 = vpop.permute.xlu0 %1074 }
 0x974   :  { %v1077_v59 = vmul.f32 %v2515_v57, %v1075_v58 }
 0x976   :  { %1079 = vrot.lane.b32.xlu1 %v1077_v59, %s2596_s16 }
 0x984   :  { %v1061_v62 = vpop.f32.mrb[10].mxu1 }
 0x985   :  { %v1110_v63 = vadd.f32 %v1061_v62, %v2808_v32  ;;  %1093 = vrot.lane.b32.xlu0 %v1061_v62, %s2598_s14  ;;  %v2269_v1 = vpop.f32.mrb[11].mxu1 }
 0x987   :  { %1112 = vrot.lane.b32.xlu1 %v1110_v63, %s2597_s13 }
 0x9e8   :  { %v1080_v3 = vpop.permute.xlu1 %1079 }
 0x9e9   :  { %v1082_v5 = vadd.f32 %v1080_v3, %v2782_v2 }
 0x9eb   :  { %2516 = vtanh.f32 %v1082_v5 }
 0x9f5   :  { %v2517_v6 = vpop.eup %2516 }
 0x9f6   :  { %1086 = vrot.lane.b32.xlu0 %v2517_v6, %s2598_s14 }
 0x9f7   :  { %v1094_v8 = vpop.permute.xlu0 %1093 }
 0x9f8   :  { %v1096_v10 = vadd.f32 %v1094_v8, %v2787_v7  ;;  %v1103_v29 = vadd.f32 %v1094_v8, %v920_v22 }
 0x9f9   :  { %v1113_v18 = vpop.permute.xlu1 %1112 }
 0x9fa   :  { %v2071_v11 = vmul.f32 -1.442695, %v1096_v10  ;;  %v2072_v37 = vmul.f32 -1.442695, %v1103_v29 }
 0x9fc   :  { %2518 = vpow2.f32 %v2071_v11 }
 0xa06   :  { %v2519_v13 = vpop.eup %2518 }
 0xa07   :  { %v1100_v14 = vadd.f32 1.0, %v2519_v13 }
 0xa09   :  { %2520 = vrcp.f32 %v1100_v14 }
 0xa13   :  { %v2521_v16 = vpop.eup %2520 }
 0xa14   :  { %v1115_v19 = vmul.f32 %v2521_v16, %v1113_v18  ;;  %v1144_v18 = vld [vmem:[#allocation2 + $0x38] sm:$0xff] }
 0xa16   :  { %1117 = vrot.lane.b32.xlu1 %v1115_v19, %s2596_s16 }
 0xa68   :  { %v1087_v23 = vpop.permute.xlu0 %1086 }
 0xa69   :  { %v1089_v28 = vmul.f32 %v1087_v23, %v1084_v20 }
 0xa6b   :  { %v2930_v30 = vadd.f32 %v1090_v24, %v1089_v28 }
 0xa6d   :  { %1131 = vrot.lane.b32.xlu0 %v2930_v30, %s2598_s14 }
 0xa88   :  { %v1118_v35 = vpop.permute.xlu1 %1117 }
 0xa89   :  { %v1120_v36 = vadd.f32 %v1118_v35, %v920_v22 }
 0xa8b   :  { %2522 = vtanh.f32 %v1120_v36 }
 0xa8c   :  { %2524 = vpow2.f32 %v2072_v37 }
 0xa95   :  { %v2523_v25 = vpop.eup %2522 }
 0xa96   :  { %1124 = vrot.lane.b32.xlu1 %v2523_v25, %s2598_s14  ;;  %v2525_v33 = vpop.eup %2524 }
 0xa97   :  { %v1107_v38 = vadd.f32 1.0, %v2525_v33 }
 0xa99   :  { %2526 = vrcp.f32 %v1107_v38 }
 0xaa3   :  { %v2527_v39 = vpop.eup %2526 }
 0xaa4   :  { %v1122_v40 = vsub.f32 1.0, %v2527_v39  ;;  %v1128_v42 = vmul.f32 %v2527_v39, %v2908_v47 }
 0xadf   :  { %v1132_v26 = vpop.permute.xlu0 %1131 }
 0xae0   :  { %2073 = vst.msk [vmem:[%s3142_s6 + $0x18] sm:$0xff] %vm220_vm3, %v1132_v26  ;;  %2279 = vmatmul.mubr.msk.f32.vlgmr.msra.gmra.mrb[20].mxu0 %vm220_vm3, %v1132_v26 }
 0xae1   :  { %2424 = vmatpush3.bf16.msra.mxu0 %v2656_v9  ;;  %2300 = vmatprep.mubr.msk.f32.mxu0 %vm2595_vm0, %v2594_v4 }
 0xae2   :  { %2425 = vmatprep.subr.bf16.mxu0 %v2593_v0 }
 0xae5   :  { %2427 = vmatpush3.bf16.msra.mxu0 %v2673_v15 }
 0xae6   :  { %2434 = vmatprep.subr.bf16.mxu0 %v2593_v0 }
 0xb08   :  { %v1125_v41 = vpop.permute.xlu1 %1124 }
 0xb09   :  { %v1127_v43 = vmul.f32 %v1125_v41, %v1122_v40 }
 0xb0b   :  { %v2947_v44 = vadd.f32 %v1128_v42, %v1127_v43 }
 0xb0d   :  { %2290 = vmatmul.mubr.msk.f32.vlgmr.msra.gmra.mrb[12].mxu1 %vm220_vm3, %v2947_v44 }
 0xb0e   :  { %2430 = vmatpush3.bf16.msra.mxu1 %v2710_v27  ;;  %2311 = vmatprep.mubr.msk.f32.mxu1 %vm2595_vm0, %v2594_v4 }
 0xb0f   :  { %2431 = vmatprep.subr.bf16.mxu1 %v2593_v0 }
 0xb12   :  { %2433 = vmatpush3.bf16.msra.mxu1 %v2720_v31 }
 0xb13   :  { %2440 = vmatprep.subr.bf16.mxu1 %v2593_v0 }
 0xbb3   :  { %v1213_v45 = vpop.f32.mrb[20].mxu0 }
 0xbb4   :  { %v1296_v46 = vadd.f32 %v1213_v45, %v2725_v34  ;;  %v2280_v48 = vpop.f32.mrb[21].mxu0  ;;  %v1289_v52 = vadd.f32 %v1213_v45, %v2787_v7 }
 0xbb6   :  { %1298 = vrot.lane.b32.xlu0 %v1296_v46, %s2596_s16  ;;  %v2077_v53 = vmul.f32 -1.442695, %v1289_v52 }
 0xbb8   :  { %2528 = vpow2.f32 %v2077_v53 }
 0xbc2   :  { %v2529_v54 = vpop.eup %2528 }
 0xbc3   :  { %v1293_v55 = vadd.f32 1.0, %v2529_v54 }
 0xbc5   :  { %2530 = vrcp.f32 %v1293_v55 }
 0xbcf   :  { %v2531_v57 = vpop.eup %2530 }
 0xbd0   :  { %v1308_v20 = vsub.f32 1.0, %v2531_v57  ;;  %v1314_v24 = vmul.f32 %v2531_v57, %v2930_v30 }
 0xbe0   :  { %v1285_v49 = vpop.f32.mrb[12].mxu1 }
 0xbe1   :  { %1317 = vrot.lane.b32.xlu0 %v1285_v49, %s2598_s14  ;;  %v2291_v50 = vpop.f32.mrb[13].mxu1  ;;  %v1334_v62 = vadd.f32 %v1285_v49, %v2808_v32 }
 0xc28   :  { %v1299_v58 = vpop.permute.xlu0 %1298 }
 0xc29   :  { %v1301_v59 = vmul.f32 %v2531_v57, %v1299_v58 }
 0xc2b   :  { %1303 = vrot.lane.b32.xlu1 %v1301_v59, %s2596_s16 }
 0xc2f   :  { %1336 = vrot.lane.b32.xlu1 %v1334_v62, %s2597_s13 }
 0xc53   :  { %v1318_v63 = vpop.permute.xlu0 %1317 }
 0xc54   :  { %v1320_v1 = vadd.f32 %v1318_v63, %v2782_v2  ;;  %v1327_v35 = vadd.f32 %v1318_v63, %v1144_v18 }
 0xc56   :  { %v2078_v3 = vmul.f32 -1.442695, %v1320_v1  ;;  %v2079_v36 = vmul.f32 -1.442695, %v1327_v35 }
 0xc58   :  { %2532 = vpow2.f32 %v2078_v3 }
 0xc62   :  { %v2533_v5 = vpop.eup %2532 }
 0xc63   :  { %v1324_v6 = vadd.f32 1.0, %v2533_v5 }
 0xc65   :  { %2534 = vrcp.f32 %v1324_v6 }
 0xc6f   :  { %v2535_v11 = vpop.eup %2534 }
 0xc9d   :  { %v1304_v8 = vpop.permute.xlu1 %1303 }
 0xc9e   :  { %v1306_v10 = vadd.f32 %v1304_v8, %v2787_v7 }
 0xca0   :  { %2536 = vtanh.f32 %v1306_v10 }
 0xca1   :  { %v1337_v13 = vpop.permute.xlu1 %1336 }
 0xca2   :  { %v1339_v14 = vmul.f32 %v2535_v11, %v1337_v13  ;;  %v1366_v13 = vld [vmem:[#allocation2 + $0x28] sm:$0xff] }
 0xca4   :  { %1341 = vrot.lane.b32.xlu1 %v1339_v14, %s2596_s16 }
 0xcaa   :  { %v2537_v16 = vpop.eup %2536 }
 0xcab   :  { %1310 = vrot.lane.b32.xlu0 %v2537_v16, %s2598_s14 }
 0xd16   :  { %v1342_v19 = vpop.permute.xlu1 %1341 }
 0xd17   :  { %v1344_v2 = vadd.f32 %v1342_v19, %v1144_v18 }
 0xd19   :  { %2538 = vtanh.f32 %v1344_v2 }
 0xd1a   :  { %2540 = vpow2.f32 %v2079_v36 }
 0xd1d   :  { %v1311_v23 = vpop.permute.xlu0 %1310 }
 0xd1e   :  { %v1313_v28 = vmul.f32 %v1311_v23, %v1308_v20 }
 0xd20   :  { %v2969_v22 = vadd.f32 %v1314_v24, %v1313_v28 }
 0xd22   :  { %1355 = vrot.lane.b32.xlu0 %v2969_v22, %s2598_s14 }
 0xd23   :  { %v2539_v7 = vpop.eup %2538 }
 0xd24   :  { %1348 = vrot.lane.b32.xlu1 %v2539_v7, %s2598_s14  ;;  %v2541_v25 = vpop.eup %2540 }
 0xd25   :  { %v1331_v26 = vadd.f32 1.0, %v2541_v25 }
 0xd27   :  { %2542 = vrcp.f32 %v1331_v26 }
 0xd31   :  { %v2543_v29 = vpop.eup %2542 }
 0xd32   :  { %v1346_v30 = vsub.f32 1.0, %v2543_v29  ;;  %v1352_v38 = vmul.f32 %v2543_v29, %v2947_v44 }
 0xd94   :  { %v2974_v37 = vpop.permute.xlu0 %1355 }
 0xd95   :  { %2301 = vmatmul.mubr.msk.f32.vlgmr.msra.gmra.mrb[22].mxu0 %vm220_vm3, %v2974_v37 }
 0xd96   :  { %v1349_v33 = vpop.permute.xlu1 %1348  ;;  %2436 = vmatpush3.bf16.msra.mxu0 %v2656_v9  ;;  %2322 = vmatprep.mubr.msk.f32.mxu0 %vm2595_vm0, %v2594_v4 }
 0xd97   :  { %v1351_v39 = vmul.f32 %v1349_v33, %v1346_v30  ;;  %2437 = vmatprep.subr.bf16.mxu0 %v2593_v0 }
 0xd99   :  { %v2983_v40 = vadd.f32 %v1352_v38, %v1351_v39 }
 0xd9a   :  { %2439 = vmatpush3.bf16.msra.mxu0 %v2673_v15 }
 0xd9b   :  { %2312 = vmatmul.mubr.msk.f32.vlgmr.msra.gmra.mrb[14].mxu1 %vm220_vm3, %v2983_v40  ;;  %2446 = vmatprep.subr.bf16.mxu0 %v2593_v0 }
 0xd9c   :  { %2442 = vmatpush3.bf16.msra.mxu1 %v2710_v27  ;;  %2333 = vmatprep.mubr.msk.f32.mxu1 %vm2595_vm0, %v2594_v4 }
 0xd9d   :  { %2443 = vmatprep.subr.bf16.mxu1 %v2593_v0 }
 0xda0   :  { %2445 = vmatpush3.bf16.msra.mxu1 %v2720_v31 }
 0xda1   :  { %2452 = vmatprep.subr.bf16.mxu1 %v2593_v0 }
 0xe68   :  { %v1435_v41 = vpop.f32.mrb[22].mxu0 }
 0xe69   :  { %v1518_v42 = vadd.f32 %v1435_v41, %v2725_v34  ;;  %v2302_v43 = vpop.f32.mrb[23].mxu0  ;;  %v1511_v49 = vadd.f32 %v1435_v41, %v2792_v12 }
 0xe6b   :  { %1520 = vrot.lane.b32.xlu0 %v1518_v42, %s2596_s16  ;;  %v2084_v50 = vmul.f32 -1.442695, %v1511_v49 }
 0xe6d   :  { %2544 = vpow2.f32 %v2084_v50 }
 0xe6e   :  { %v1507_v45 = vpop.f32.mrb[14].mxu1 }
 0xe6f   :  { %1539 = vrot.lane.b32.xlu1 %v1507_v45, %s2598_s14  ;;  %v2313_v46 = vpop.f32.mrb[15].mxu1  ;;  %v1556_v48 = vadd.f32 %v1507_v45, %v2808_v32 }
 0xe73   :  { %1558 = vrot.lane.b32.xlu1 %v1556_v48, %s2597_s13 }
 0xe77   :  { %v2545_v52 = vpop.eup %2544 }
 0xe78   :  { %v1515_v53 = vadd.f32 1.0, %v2545_v52 }
 0xe7a   :  { %2546 = vrcp.f32 %v1515_v53 }
 0xe84   :  { %v2547_v54 = vpop.eup %2546 }
 0xe85   :  { %v1530_v2 = vsub.f32 1.0, %v2547_v54  ;;  %v1536_v23 = vmul.f32 %v2547_v54, %v2969_v22 }
 0xedd   :  { %v1521_v55 = vpop.permute.xlu0 %1520 }
 0xede   :  { %v1523_v57 = vmul.f32 %v2547_v54, %v1521_v55 }
 0xee0   :  { %1525 = vrot.lane.b32.xlu0 %v1523_v57, %s2596_s16 }
 0xee1   :  { %v1540_v58 = vpop.permute.xlu1 %1539 }
 0xee2   :  { %v1542_v59 = vadd.f32 %v1540_v58, %v2776_v60  ;;  %v1549_v18 = vadd.f32 %v1540_v58, %v1366_v13  ;;  %v1588_v58 = vld [vmem:[#allocation2 + $0x18] sm:$0xff] }
 0xee4   :  { %v2085_v62 = vmul.f32 -1.442695, %v1542_v59  ;;  %v2086_v19 = vmul.f32 -1.442695, %v1549_v18 }
 0xee5   :  { %v1559_v5 = vpop.permute.xlu1 %1558 }
 0xee6   :  { %2548 = vpow2.f32 %v2085_v62 }
 0xef0   :  { %v2549_v63 = vpop.eup %2548 }
 0xef1   :  { %v1546_v1 = vadd.f32 1.0, %v2549_v63 }
 0xef3   :  { %2550 = vrcp.f32 %v1546_v1 }
 0xefd   :  { %v2551_v3 = vpop.eup %2550 }
 0xefe   :  { %v1561_v6 = vmul.f32 %v2551_v3, %v1559_v5 }
 0xf00   :  { %1563 = vrot.lane.b32.xlu0 %v1561_v6, %s2596_s16 }
 0xf52   :  { %v1526_v8 = vpop.permute.xlu0 %1525 }
 0xf53   :  { %v1528_v10 = vadd.f32 %v1526_v8, %v2792_v12 }
 0xf55   :  { %2552 = vtanh.f32 %v1528_v10 }
 0xf5f   :  { %v2553_v11 = vpop.eup %2552 }
 0xf60   :  { %1532 = vrot.lane.b32.xlu1 %v2553_v11, %s2598_s14 }
 0xf72   :  { %v1564_v14 = vpop.permute.xlu0 %1563 }
 0xf73   :  { %v1566_v60 = vadd.f32 %v1564_v14, %v1366_v13 }
 0xf75   :  { %2554 = vtanh.f32 %v1566_v60 }
 0xf76   :  { %2556 = vpow2.f32 %v2086_v19 }
 0xf7f   :  { %v2555_v16 = vpop.eup %2554 }
 0xf80   :  { %1570 = vrot.lane.b32.xlu1 %v2555_v16, %s2598_s14  ;;  %v2557_v28 = vpop.eup %2556 }
 0xf81   :  { %v1553_v7 = vadd.f32 1.0, %v2557_v28 }
 0xf83   :  { %2558 = vrcp.f32 %v1553_v7 }
 0xf8d   :  { %v2559_v35 = vpop.eup %2558 }
 0xf8e   :  { %v1568_v36 = vsub.f32 1.0, %v2559_v35  ;;  %v1574_v26 = vmul.f32 %v2559_v35, %v2983_v40 }
 0xfd2   :  { %v1533_v20 = vpop.permute.xlu1 %1532 }
 0xfd3   :  { %v1535_v24 = vmul.f32 %v1533_v20, %v1530_v2 }
 0xfd5   :  { %v3008_v12 = vadd.f32 %v1536_v23, %v1535_v24 }
 0xfd7   :  { %1577 = vrot.lane.b32.xlu0 %v3008_v12, %s2598_s14 }
 0xff2   :  { %v1571_v25 = vpop.permute.xlu1 %1570 }
 0xff3   :  { %v1573_v29 = vmul.f32 %v1571_v25, %v1568_v36  ;;  %v1809_v25 = vld [vmem:[#allocation2] sm:$0xff] }
 0xff5   :  { %v3013_v30 = vadd.f32 %v1574_v26, %v1573_v29 }
 0xff7   :  { %2334 = vmatmul.mubr.msk.f32.vlgmr.msra.gmra.mrb[16].mxu1 %vm220_vm3, %v3013_v30 }
 0xff8   :  { %2454 = vmatpush3.bf16.msra.mxu1 %v2710_v27  ;;  %2355 = vmatprep.mubr.msk.f32.mxu1 %vm2595_vm0, %v2594_v4 }
 0xff9   :  { %2455 = vmatprep.subr.bf16.mxu1 %v2593_v0 }
 0xffc   :  { %2457 = vmatpush3.bf16.msra.mxu1 %v2720_v31 }
0x1049   :  { %v3022_v22 = vpop.permute.xlu0 %1577 }
0x104a   :  { %2323 = vmatmul.mubr.msk.f32.vlgmr.msra.gmra.mrb[24].mxu0 %vm220_vm3, %v3022_v22 }
0x104b   :  { %2448 = vmatpush3.bf16.msra.mxu0 %v2656_v9  ;;  %2344 = vmatprep.mubr.msk.f32.mxu0 %vm2595_vm0, %v2594_v4 }
0x104c   :  { %2449 = vmatprep.subr.bf16.mxu0 %v2593_v0 }
0x104f   :  { %2451 = vmatpush3.bf16.msra.mxu0 %v2673_v15 }
0x10ca   :  { %v1729_v27 = vpop.f32.mrb[16].mxu1 }
0x10cb   :  { %1761 = vrot.lane.b32.xlu1 %v1729_v27, %s2598_s14  ;;  %v2335_v33 = vpop.f32.mrb[17].mxu1  ;;  %v1778_v41 = vadd.f32 %v1729_v27, %v2808_v32 }
0x111d   :  { %v1657_v38 = vpop.f32.mrb[24].mxu0 }
0x111e   :  { %v1740_v31 = vadd.f32 %v1657_v38, %v2725_v34  ;;  %v2324_v39 = vpop.f32.mrb[25].mxu0  ;;  %v1733_v4 = vadd.f32 %v1657_v38, %v2797_v17 }
0x1120   :  { %1742 = vrot.lane.b32.xlu0 %v1740_v31, %s2596_s16  ;;  %v2091_v0 = vmul.f32 -1.442695, %v1733_v4 }
0x1122   :  { %2560 = vpow2.f32 %v2091_v0 }
0x1124   :  { %1780 = vrot.lane.b32.xlu0 %v1778_v41, %s2597_s13 }
0x112c   :  { %v2561_v43 = vpop.eup %2560 }
0x112d   :  { %v1737_v45 = vadd.f32 1.0, %v2561_v43  ;;  %v1810_v43 = vld [vmem:[#allocation2 + $0x8] sm:$0xff] }
0x113d   :  { %v1762_v9 = vpop.permute.xlu1 %1761 }
0x113e   :  { %v1764_v15 = vadd.f32 %v1762_v9, %v2772_v56  ;;  %v1771_v3 = vadd.f32 %v1762_v9, %v1588_v58 }
0x1140   :  { %v2092_v42 = vmul.f32 -1.442695, %v1764_v15  ;;  %v2093_v5 = vmul.f32 -1.442695, %v1771_v3 }
0x1142   :  { %2562 = vpow2.f32 %v2092_v42 }
0x1143   :  { %2564 = vrcp.f32 %v1737_v45 }
0x114c   :  { %v2563_v46 = vpop.eup %2562 }
0x114d   :  { %v1768_v48 = vadd.f32 1.0, %v2563_v46  ;;  %v2565_v49 = vpop.eup %2564 }
0x114e   :  { %v1752_v10 = vsub.f32 1.0, %v2565_v49  ;;  %v1758_v13 = vmul.f32 %v2565_v49, %v3008_v12 }
0x114f   :  { %2566 = vrcp.f32 %v1768_v48 }
0x1159   :  { %v2567_v53 = vpop.eup %2566 }
0x1192   :  { %v1743_v50 = vpop.permute.xlu0 %1742 }
0x1193   :  { %v1745_v52 = vmul.f32 %v2565_v49, %v1743_v50  ;;  %v2592_v49 = vld [vmem:[#allocation2 + $0x70] sm:$0xff] }
0x1195   :  { %1747 = vrot.lane.b32.xlu1 %v1745_v52, %s2596_s16 }
0x1196   :  { %v1781_v54 = vpop.permute.xlu0 %1780 }
0x1197   :  { %v1783_v55 = vmul.f32 %v2567_v53, %v1781_v54 }
0x1199   :  { %1785 = vrot.lane.b32.xlu0 %v1783_v55, %s2596_s16 }
0x1207   :  { %v1748_v56 = vpop.permute.xlu1 %1747 }
0x1208   :  { %v1750_v57 = vadd.f32 %v1748_v56, %v2797_v17 }
0x120a   :  { %2568 = vtanh.f32 %v1750_v57 }
0x120b   :  { %v1786_v59 = vpop.permute.xlu0 %1785 }
0x120c   :  { %v1788_v62 = vadd.f32 %v1786_v59, %v1588_v58 }
0x120e   :  { %2570 = vtanh.f32 %v1788_v62 }
0x120f   :  { %2572 = vpow2.f32 %v2093_v5 }
0x1214   :  { %v2569_v63 = vpop.eup %2568 }
0x1215   :  { %1754 = vrot.lane.b32.xlu1 %v2569_v63, %s2598_s14 }
0x1218   :  { %v2571_v1 = vpop.eup %2570 }
0x1219   :  { %1792 = vrot.lane.b32.xlu0 %v2571_v1, %s2598_s14  ;;  %v2573_v6 = vpop.eup %2572 }
0x121a   :  { %v1775_v8 = vadd.f32 1.0, %v2573_v6 }
0x121c   :  { %2574 = vrcp.f32 %v1775_v8 }
0x1226   :  { %v2575_v11 = vpop.eup %2574 }
0x1227   :  { %v1790_v16 = vsub.f32 1.0, %v2575_v11  ;;  %v1796_v19 = vmul.f32 %v2575_v11, %v3013_v30 }
0x1287   :  { %v1755_v17 = vpop.permute.xlu1 %1754 }
0x1288   :  { %v1757_v14 = vmul.f32 %v1755_v17, %v1752_v10 }
0x128a   :  { %v3044_v60 = vadd.f32 %v1758_v13, %v1757_v14 }
0x128b   :  { %v1793_v18 = vpop.permute.xlu0 %1792 }
0x128c   :  { %v1795_v2 = vmul.f32 %v1793_v18, %v1790_v16  ;;  %1799 = vrot.lane.b32.xlu1 %v3044_v60, %s2598_s14 }
0x128e   :  { %v3049_v20 = vadd.f32 %v1796_v19, %v1795_v2 }
0x1290   :  { %2356 = vmatmul.mubr.msk.f32.vlgmr.msra.gmra.mrb[18].mxu1 %vm220_vm3, %v3049_v20 }
0x12fe   :  { %v3053_v23 = vpop.permute.xlu1 %1799 }
0x12ff   :  { %2345 = vmatmul.mubr.msk.f32.vlgmr.msra.gmra.mrb[26].mxu0 %vm220_vm3, %v3053_v23 }
0x1363   :  { %v1951_v24 = vpop.f32.mrb[18].mxu1 }
0x1364   :  { %1983 = vrot.lane.b32.xlu0 %v1951_v24, %s2598_s14  ;;  %v2357_v12 = vpop.f32.mrb[19].mxu1  ;;  %v2000_v28 = vadd.f32 %v1951_v24, %v2808_v32 }
0x1368   :  { %2002 = vrot.lane.b32.xlu0 %v2000_v28, %s2597_s13 }
0x13d2   :  { %v1879_v7 = vpop.f32.mrb[26].mxu0 }
0x13d3   :  { %v1962_v35 = vadd.f32 %v1879_v7, %v2725_v34  ;;  %v2346_v36 = vpop.f32.mrb[27].mxu0  ;;  %v1955_v32 = vadd.f32 %v1879_v7, %v2803_v21 }
0x13d5   :  { %1964 = vrot.lane.b32.xlu1 %v1962_v35, %s2596_s16  ;;  %v2098_v4 = vmul.f32 -1.442695, %v1955_v32 }
0x13d6   :  { %v1984_v26 = vpop.permute.xlu0 %1983 }
0x13d7   :  { %v1986_v29 = vadd.f32 %v1984_v26, %v1809_v25  ;;  %v1993_v52 = vadd.f32 %v1984_v26, %v1810_v43 }
0x13d9   :  { %v2099_v27 = vmul.f32 -1.442695, %v1986_v29  ;;  %v2100_v53 = vmul.f32 -1.442695, %v1993_v52 }
0x13da   :  { %v2003_v39 = vpop.permute.xlu0 %2002 }
0x13db   :  { %2576 = vpow2.f32 %v2099_v27 }
0x13e5   :  { %v2577_v33 = vpop.eup %2576 }
0x13e6   :  { %v1990_v38 = vadd.f32 1.0, %v2577_v33 }
0x13e8   :  { %2578 = vrcp.f32 %v1990_v38 }
0x13e9   :  { %2580 = vpow2.f32 %v2098_v4 }
0x13f2   :  { %v2579_v31 = vpop.eup %2578 }
0x13f3   :  { %v2005_v41 = vmul.f32 %v2579_v31, %v2003_v39  ;;  %v2581_v34 = vpop.eup %2580 }
0x13f4   :  { %v1959_v9 = vadd.f32 1.0, %v2581_v34 }
0x13f5   :  { %2007 = vrot.lane.b32.xlu0 %v2005_v41, %s2596_s16 }
0x13f6   :  { %2582 = vrcp.f32 %v1959_v9 }
0x1400   :  { %v2583_v0 = vpop.eup %2582 }
0x1401   :  { %v1974_v62 = vsub.f32 1.0, %v2583_v0  ;;  %v1980_v1 = vmul.f32 %v2583_v0, %v3044_v60 }
0x1447   :  { %v1965_v15 = vpop.permute.xlu1 %1964 }
0x1448   :  { %v1967_v42 = vmul.f32 %v2583_v0, %v1965_v15 }
0x144a   :  { %1969 = vrot.lane.b32.xlu1 %v1967_v42, %s2596_s16 }
0x1467   :  { %v2008_v45 = vpop.permute.xlu0 %2007 }
0x1468   :  { %v2010_v46 = vadd.f32 %v2008_v45, %v1810_v43 }
0x146a   :  { %2584 = vtanh.f32 %v2010_v46 }
0x1474   :  { %v2585_v48 = vpop.eup %2584 }
0x1475   :  { %2014 = vrot.lane.b32.xlu0 %v2585_v48, %s2598_s14 }
0x1479   :  { %677 = vrot.lane.b32.xlu0 %v2869_v51, %s2597_s13 }
0x147d   :  { %1137 = vrot.lane.b32.xlu0 %v2947_v44, %s2597_s13 }
0x1481   :  { %1582 = vrot.lane.b32.xlu0 %v3013_v30, %s2597_s13 }
0x14bc   :  { %v1970_v21 = vpop.permute.xlu1 %1969 }
0x14bd   :  { %v1972_v50 = vadd.f32 %v2592_v49, %v1970_v21 }
0x14bf   :  { %2586 = vtanh.f32 %v1972_v50 }
0x14c0   :  { %2588 = vpow2.f32 %v2100_v53 }
0x14c9   :  { %v2587_v54 = vpop.eup %2586 }
0x14ca   :  { %1976 = vrot.lane.b32.xlu1 %v2587_v54, %s2598_s14  ;;  %v2589_v51 = vpop.eup %2588 }
0x14cb   :  { %v1997_v44 = vadd.f32 1.0, %v2589_v51 }
0x14cd   :  { %2590 = vrcp.f32 %v1997_v44 }
0x14ce   :  { %446 = vrot.lane.b32.xlu1 %v2832_v61, %s2597_s13 }
0x14d2   :  { %907 = vrot.lane.b32.xlu1 %v2908_v47, %s2597_s13 }
0x14d6   :  { %1360 = vrot.lane.b32.xlu1 %v2983_v40, %s2597_s13 }
0x14d7   :  { %v2591_v30 = vpop.eup %2590 }
0x14d8   :  { %v2012_v55 = vsub.f32 1.0, %v2591_v30  ;;  %v2018_v57 = vmul.f32 %v2591_v30, %v3049_v20 }
0x14da   :  { %1804 = vrot.lane.b32.xlu1 %v3049_v20, %s2597_s13 }
0x14e7   :  { %v2015_v56 = vpop.permute.xlu0 %2014 }
0x14e8   :  { %v2017_v58 = vmul.f32 %v2015_v56, %v2012_v55 }
0x14ea   :  { %v2019_v61 = vadd.f32 %v2018_v57, %v2017_v58 }
0x14eb   :  { %v678_v59 = vpop.permute.xlu0 %677 }
0x14ec   :  { %2060 = vst.msk [vmem:[%s3142_s6 + $0x30] sm:$0xff] %vm450_vm4, %v678_v59  ;;  %2026 = vrot.lane.b32.xlu1 %v2019_v61, %s2597_s13 }
0x14ed   :  { %2094 = vst.msk [vmem:[%s3142_s6 + $0x30] sm:$0xff] %vm220_vm3, %v3053_v23 }
0x14ef   :  { %v1138_v47 = vpop.permute.xlu0 %1137 }
0x14f0   :  { %2074 = vst.msk [vmem:[%s3142_s6 + $0x20] sm:$0xff] %vm450_vm4, %v1138_v47 }
0x14f1   :  { %2080 = vst.msk [vmem:[%s3142_s6 + $0x20] sm:$0xff] %vm220_vm3, %v2974_v37 }
0x14f3   :  { %v1583_v40 = vpop.permute.xlu0 %1582 }
0x14f4   :  { %2088 = vst.msk [vmem:[%s3142_s6 + $0x10] sm:$0xff] %vm450_vm4, %v1583_v40 }
0x153c   :  { %v1977_v63 = vpop.permute.xlu1 %1976 }
0x153d   :  { %v1979_v3 = vmul.f32 %v1977_v63, %v1974_v62 }
0x153f   :  { %v1981_v5 = vadd.f32 %v1980_v1, %v1979_v3 }
0x1540   :  { %v447_v6 = vpop.permute.xlu1 %446 }
0x1541   :  { %2053 = vst.msk [vmem:[%s3142_s6 + $0x38] sm:$0xff] %vm450_vm4, %v447_v6  ;;  %2021 = vrot.lane.b32.xlu0 %v1981_v5, %s2598_s14 }
0x1544   :  { %v908_v37 = vpop.permute.xlu1 %907 }
0x1545   :  { %2067 = vst.msk [vmem:[%s3142_s6 + $0x28] sm:$0xff] %vm450_vm4, %v908_v37 }
0x1546   :  { %2087 = vst.msk [vmem:[%s3142_s6 + $0x28] sm:$0xff] %vm220_vm3, %v3022_v22 }
0x1548   :  { %v1361_v8 = vpop.permute.xlu1 %1360 }
0x1549   :  { %2081 = vst.msk [vmem:[%s3142_s6 + $0x18] sm:$0xff] %vm450_vm4, %v1361_v8 }
0x154c   :  { %v1805_v10 = vpop.permute.xlu1 %1804 }
0x154d   :  { %2095 = vst.msk [vmem:[%s3142_s6 + $0x8] sm:$0xff] %vm450_vm4, %v1805_v10 }
0x155e   :  { %v2027_v11 = vpop.permute.xlu1 %2026 }
0x155f   :  { %2029 = vst.msk [vmem:[%s3142_s6] sm:$0xff] %vm450_vm4, %v2027_v11 }
0x15b3   :  { %v2022_v17 = vpop.permute.xlu0 %2021 }
0x15b4   :  { %2101 = vst.msk [vmem:[%s3142_s6 + $0x38] sm:$0xff] %vm220_vm3, %v2022_v17 }

</bundles_post_ra>
